<compile_context>
chip_gen: v7x
topology: tpu7x:2x2x1
jax: 0.10.0
libtpu: 0.0.40
codegen_flags: <defaults>
</compile_context>

<pallas_src>
import functools

import jax
import jax.numpy as jnp
from jax.experimental import pallas as pl
from jax.experimental.pallas import tpu as pltpu

LANE = 128
BF16_SUBLANE = 16          # native bf16 tile is (16, 128)
MAX_BATCH_TILE = 256       # rows per grid step (review: 256-512)


def _round_up(x, m):
    return ((x + m - 1) // m) * m


def mlp_fused_kernel(x_ref, w0_ref, b0_ref, w1_ref, b1_ref, w2_ref, b2_ref,
                     w3_ref, b3_ref, wN_ref, bN_ref, o_ref):
    """y = relu(...relu(relu(x@W0+b0)@W1+b1)...@WN+bN) for one batch tile.

    Weights/biases are whole-array blocks with a constant index_map, so they
    are fetched into VMEM once and reused for every batch tile.
    """

    def layer(h_bf16, w_ref, b_ref):
        # bf16 x bf16 matmul on the MXU, f32 accumulation, f32 bias + ReLU.
        y = jnp.dot(h_bf16, w_ref[...], preferred_element_type=jnp.float32)
        return jnp.maximum(y + b_ref[...], 0.0)

    h = x_ref[...].astype(jnp.bfloat16)                # in-kernel cast (VPU)
    h = layer(h, w0_ref, b0_ref).astype(jnp.bfloat16)  # stays in vregs/VMEM
    h = layer(h, w1_ref, b1_ref).astype(jnp.bfloat16)
    h = layer(h, w2_ref, b2_ref).astype(jnp.bfloat16)
    h = layer(h, w3_ref, b3_ref).astype(jnp.bfloat16)
    o_ref[...] = layer(h, wN_ref, bN_ref)              # f32, lane-dense store


def init_linear(key, in_features, out_features):
    """Deterministic init mimicking nn.Linear's U(-1/sqrt(in), 1/sqrt(in)).
    Weight stored as (in, out), i.e. pre-transposed vs. PyTorch's (out, in)."""
    kw, kb = jax.random.split(key)
    bound = 1.0 / (in_features ** 0.5)
    w_t = jax.random.uniform(kw, (in_features, out_features), jnp.float32,
                             minval=-bound, maxval=bound)
    b = jax.random.uniform(kb, (out_features,), jnp.float32,
                           minval=-bound, maxval=bound)
    return w_t, b


def prepare_params(params):
    """Cast weights to bf16; zero-pad ONLY the last layer's output columns up
    to a multiple of 128 (lane-dense output store). Padding is exact."""
    n_layers = len(params)
    prepared = []
    for idx, (w_t, b) in enumerate(params):
        k, n = w_t.shape
        n_pad = _round_up(n, LANE) if idx == n_layers - 1 else n
        w_p = jnp.zeros((k, n_pad), jnp.bfloat16)
        w_p = w_p.at[:, :n].set(w_t.astype(jnp.bfloat16))
        b_p = jnp.zeros((1, n_pad), jnp.float32).at[0, :n].set(b)
        prepared.append((w_p, b_p))
    return prepared


@functools.partial(jax.jit, static_argnames=("n_logits",))
def mlp_forward(x_nchw, prep, *, n_logits=10):
    (w0, b0), (w1, b1), (w2, b2), (w3, b3), (wN, bN) = prep
    B = x_nchw.shape[0]
    x = x_nchw.reshape(B, -1).astype(jnp.float32)   # matches x.view(B, -1)
    K = x.shape[1]                                  # 784, full-dim (no pad)
    N_pad = bN.shape[1]                             # 128

    # Batch tile: multiple of 16 (bf16 sublane packing), capped at 256 rows.
    bt = min(MAX_BATCH_TILE, _round_up(B, BF16_SUBLANE))
    bt = _round_up(bt, BF16_SUBLANE)
    B_pad = _round_up(B, bt)
    if B_pad != B:
        x = jnp.pad(x, ((0, B_pad - B), (0, 0)))    # rows are independent
    grid = (B_pad // bt,)

    batch_map = lambda i: (i, 0)      # advances with the batch tile
    const_map = lambda i: (0, 0)      # weights/biases resident in VMEM

    in_specs = [pl.BlockSpec((bt, K), batch_map)]
    for (w, b) in ((w0, b0), (w1, b1), (w2, b2), (w3, b3), (wN, bN)):
        in_specs.append(pl.BlockSpec(w.shape, const_map))
        in_specs.append(pl.BlockSpec(b.shape, const_map))

    out_pad = pl.pallas_call(
        mlp_fused_kernel,
        out_shape=jax.ShapeDtypeStruct((B_pad, N_pad), jnp.float32),
        grid=grid,
        in_specs=in_specs,
        out_specs=pl.BlockSpec((bt, N_pad), batch_map),
        compiler_params=pltpu.CompilerParams(
            dimension_semantics=("parallel",)),
    )(x, w0, b0, w1, b1, w2, b2, w3, b3, wN, bN)

    return out_pad[:B, :n_logits]


def _reference(x_nchw, params):
    """Plain-JAX reference of the SAME math (bf16 weights & activations,
    f32 accumulation + bias + ReLU), using the original unpadded params."""
    h = x_nchw.reshape(x_nchw.shape[0], -1).astype(jnp.float32)
    for (w_t, b) in params:
        y = jnp.dot(h.astype(jnp.bfloat16), w_t.astype(jnp.bfloat16),
                    preferred_element_type=jnp.float32)
        h = jnp.maximum(y + b, 0.0)
    return h


if __name__ == "__main__":
    key = jax.random.PRNGKey(0)
    k_in, k_in2, k0, k1, k2, k3, kN = jax.random.split(key, 7)

    params = [
        init_linear(k0, 28 * 28, 512),   # layer0
        init_linear(k1, 512, 512),       # layers[0]
        init_linear(k2, 512, 512),       # layers[1]
        init_linear(k3, 512, 512),       # layers[2]
        init_linear(kN, 512, 10),        # layerN
    ]
    prep = prepare_params(params)

    # Case 1: tiny batch (single padded tile), NCHW input -> view(B, -1).
    B1 = 4
    x1 = jax.random.normal(k_in, (B1, 1, 28, 28), jnp.float32)
    out1 = jax.block_until_ready(mlp_forward(x1, prep))
    assert out1.shape == (B1, 10)
    ref1 = _reference(x1, params)
    assert jnp.allclose(out1, ref1, atol=5e-3, rtol=5e-3), (
        float(jnp.max(jnp.abs(out1 - ref1))))

    # Case 2: multi-tile batch (exercises the grid + megacore sharding path).
    B2 = 300
    x2 = jax.random.normal(k_in2, (B2, 1, 28, 28), jnp.float32)
    out2 = jax.block_until_ready(mlp_forward(x2, prep))
    assert out2.shape == (B2, 10)
    ref2 = _reference(x2, params)
    assert jnp.allclose(out2, ref2, atol=5e-3, rtol=5e-3), (
        float(jnp.max(jnp.abs(out2 - ref2))))

    print("KERNEL_OK")
</pallas_src>

<mosaic_0001>
module attributes {stable_mosaic.version = 11 : i64} {
  func.func @mlp_fused_kernel(%arg0: i32, %arg1: memref<16x784xf32, #tpu.memory_space<vmem>>, %arg2: memref<784x512xbf16, #tpu.memory_space<vmem>>, %arg3: memref<1x512xf32, #tpu.memory_space<vmem>>, %arg4: memref<512x512xbf16, #tpu.memory_space<vmem>>, %arg5: memref<1x512xf32, #tpu.memory_space<vmem>>, %arg6: memref<512x512xbf16, #tpu.memory_space<vmem>>, %arg7: memref<1x512xf32, #tpu.memory_space<vmem>>, %arg8: memref<512x512xbf16, #tpu.memory_space<vmem>>, %arg9: memref<1x512xf32, #tpu.memory_space<vmem>>, %arg10: memref<512x128xbf16, #tpu.memory_space<vmem>>, %arg11: memref<1x128xf32, #tpu.memory_space<vmem>>, %arg12: memref<16x128xf32, #tpu.memory_space<vmem>>) attributes {dimension_semantics = [#tpu.dimension_semantics<parallel>], iteration_bounds = array<i64: 1>, scalar_prefetch = 0 : i64, scratch_operands = 0 : i64, tpu.core_type = #tpu.core_type<tc>, window_params = [{transform_indices = @transform_0, window_bounds = array<i64: 16, 784>}, {pipeline_mode = #tpu.pipeline_mode<synchronous>, transform_indices = @transform_1, window_bounds = array<i64: 784, 512>}, {pipeline_mode = #tpu.pipeline_mode<synchronous>, transform_indices = @transform_2, window_bounds = array<i64: 1, 512>}, {pipeline_mode = #tpu.pipeline_mode<synchronous>, transform_indices = @transform_3, window_bounds = array<i64: 512, 512>}, {pipeline_mode = #tpu.pipeline_mode<synchronous>, transform_indices = @transform_4, window_bounds = array<i64: 1, 512>}, {pipeline_mode = #tpu.pipeline_mode<synchronous>, transform_indices = @transform_5, window_bounds = array<i64: 512, 512>}, {pipeline_mode = #tpu.pipeline_mode<synchronous>, transform_indices = @transform_6, window_bounds = array<i64: 1, 512>}, {pipeline_mode = #tpu.pipeline_mode<synchronous>, transform_indices = @transform_7, window_bounds = array<i64: 512, 512>}, {pipeline_mode = #tpu.pipeline_mode<synchronous>, transform_indices = @transform_8, window_bounds = array<i64: 1, 512>}, {pipeline_mode = #tpu.pipeline_mode<synchronous>, transform_indices = @transform_9, window_bounds = array<i64: 512, 128>}, {pipeline_mode = #tpu.pipeline_mode<synchronous>, transform_indices = @transform_10, window_bounds = array<i64: 1, 128>}, {transform_indices = @transform_11, window_bounds = array<i64: 16, 128>}]} {
    %c0 = arith.constant 0 : index
    %c0_0 = arith.constant 0 : index
    %0 = vector.load %arg1[%c0, %c0_0] : memref<16x784xf32, #tpu.memory_space<vmem>>, vector<16x784xf32>
    %1 = arith.truncf %0 : vector<16x784xf32> to vector<16x784xbf16>
    %c0_1 = arith.constant 0 : index
    %c0_2 = arith.constant 0 : index
    %2 = vector.load %arg2[%c0_1, %c0_2] : memref<784x512xbf16, #tpu.memory_space<vmem>>, vector<784x512xbf16>
    %cst = arith.constant dense<0.000000e+00> : vector<16x512xf32>
    %3 = tpu.matmul %1, %2, %cst {dimension_numbers = #tpu.dot_dimension_numbers<[1], [0], [0], [1], [0, 0, 1, 1], [], []>} : vector<16x784xbf16>, vector<784x512xbf16>, vector<16x512xf32> -> vector<16x512xf32>
    %c0_3 = arith.constant 0 : index
    %c0_4 = arith.constant 0 : index
    %4 = vector.load %arg3[%c0_3, %c0_4] : memref<1x512xf32, #tpu.memory_space<vmem>>, vector<1x512xf32>
    %5 = vector.broadcast %4 : vector<1x512xf32> to vector<16x512xf32>
    %6 = arith.addf %3, %5 : vector<16x512xf32>
    %cst_5 = arith.constant 0.000000e+00 : f32
    %7 = vector.broadcast %cst_5 : f32 to vector<16x512xf32>
    %8 = arith.maximumf %6, %7 : vector<16x512xf32>
    %9 = arith.truncf %8 : vector<16x512xf32> to vector<16x512xbf16>
    %c0_6 = arith.constant 0 : index
    %c0_7 = arith.constant 0 : index
    %10 = vector.load %arg4[%c0_6, %c0_7] : memref<512x512xbf16, #tpu.memory_space<vmem>>, vector<512x512xbf16>
    %cst_8 = arith.constant dense<0.000000e+00> : vector<16x512xf32>
    %11 = tpu.matmul %9, %10, %cst_8 {dimension_numbers = #tpu.dot_dimension_numbers<[1], [0], [0], [1], [0, 0, 1, 1], [], []>} : vector<16x512xbf16>, vector<512x512xbf16>, vector<16x512xf32> -> vector<16x512xf32>
    %c0_9 = arith.constant 0 : index
    %c0_10 = arith.constant 0 : index
    %12 = vector.load %arg5[%c0_9, %c0_10] : memref<1x512xf32, #tpu.memory_space<vmem>>, vector<1x512xf32>
    %13 = vector.broadcast %12 : vector<1x512xf32> to vector<16x512xf32>
    %14 = arith.addf %11, %13 : vector<16x512xf32>
    %cst_11 = arith.constant 0.000000e+00 : f32
    %15 = vector.broadcast %cst_11 : f32 to vector<16x512xf32>
    %16 = arith.maximumf %14, %15 : vector<16x512xf32>
    %17 = arith.truncf %16 : vector<16x512xf32> to vector<16x512xbf16>
    %c0_12 = arith.constant 0 : index
    %c0_13 = arith.constant 0 : index
    %18 = vector.load %arg6[%c0_12, %c0_13] : memref<512x512xbf16, #tpu.memory_space<vmem>>, vector<512x512xbf16>
    %cst_14 = arith.constant dense<0.000000e+00> : vector<16x512xf32>
    %19 = tpu.matmul %17, %18, %cst_14 {dimension_numbers = #tpu.dot_dimension_numbers<[1], [0], [0], [1], [0, 0, 1, 1], [], []>} : vector<16x512xbf16>, vector<512x512xbf16>, vector<16x512xf32> -> vector<16x512xf32>
    %c0_15 = arith.constant 0 : index
    %c0_16 = arith.constant 0 : index
    %20 = vector.load %arg7[%c0_15, %c0_16] : memref<1x512xf32, #tpu.memory_space<vmem>>, vector<1x512xf32>
    %21 = vector.broadcast %20 : vector<1x512xf32> to vector<16x512xf32>
    %22 = arith.addf %19, %21 : vector<16x512xf32>
    %cst_17 = arith.constant 0.000000e+00 : f32
    %23 = vector.broadcast %cst_17 : f32 to vector<16x512xf32>
    %24 = arith.maximumf %22, %23 : vector<16x512xf32>
    %25 = arith.truncf %24 : vector<16x512xf32> to vector<16x512xbf16>
    %c0_18 = arith.constant 0 : index
    %c0_19 = arith.constant 0 : index
    %26 = vector.load %arg8[%c0_18, %c0_19] : memref<512x512xbf16, #tpu.memory_space<vmem>>, vector<512x512xbf16>
    %cst_20 = arith.constant dense<0.000000e+00> : vector<16x512xf32>
    %27 = tpu.matmul %25, %26, %cst_20 {dimension_numbers = #tpu.dot_dimension_numbers<[1], [0], [0], [1], [0, 0, 1, 1], [], []>} : vector<16x512xbf16>, vector<512x512xbf16>, vector<16x512xf32> -> vector<16x512xf32>
    %c0_21 = arith.constant 0 : index
    %c0_22 = arith.constant 0 : index
    %28 = vector.load %arg9[%c0_21, %c0_22] : memref<1x512xf32, #tpu.memory_space<vmem>>, vector<1x512xf32>
    %29 = vector.broadcast %28 : vector<1x512xf32> to vector<16x512xf32>
    %30 = arith.addf %27, %29 : vector<16x512xf32>
    %cst_23 = arith.constant 0.000000e+00 : f32
    %31 = vector.broadcast %cst_23 : f32 to vector<16x512xf32>
    %32 = arith.maximumf %30, %31 : vector<16x512xf32>
    %33 = arith.truncf %32 : vector<16x512xf32> to vector<16x512xbf16>
    %c0_24 = arith.constant 0 : index
    %c0_25 = arith.constant 0 : index
    %34 = vector.load %arg10[%c0_24, %c0_25] : memref<512x128xbf16, #tpu.memory_space<vmem>>, vector<512x128xbf16>
    %cst_26 = arith.constant dense<0.000000e+00> : vector<16x128xf32>
    %35 = tpu.matmul %33, %34, %cst_26 {dimension_numbers = #tpu.dot_dimension_numbers<[1], [0], [0], [1], [0, 0, 1, 1], [], []>} : vector<16x512xbf16>, vector<512x128xbf16>, vector<16x128xf32> -> vector<16x128xf32>
    %c0_27 = arith.constant 0 : index
    %c0_28 = arith.constant 0 : index
    %36 = vector.load %arg11[%c0_27, %c0_28] : memref<1x128xf32, #tpu.memory_space<vmem>>, vector<1x128xf32>
    %37 = vector.broadcast %36 : vector<1x128xf32> to vector<16x128xf32>
    %38 = arith.addf %35, %37 : vector<16x128xf32>
    %cst_29 = arith.constant 0.000000e+00 : f32
    %39 = vector.broadcast %cst_29 : f32 to vector<16x128xf32>
    %40 = arith.maximumf %38, %39 : vector<16x128xf32>
    %c0_30 = arith.constant 0 : index
    %c0_31 = arith.constant 0 : index
    %41 = vector.load %arg12[%c0_30, %c0_31] : memref<16x128xf32, #tpu.memory_space<vmem>>, vector<16x128xf32>
    tpu.vector_store %arg12[%c0_30, %c0_31], %40 {strides = array<i32>} : memref<16x128xf32, #tpu.memory_space<vmem>>, vector<16x128xf32>,
    return
  }
  func.func @transform_0(%arg0: i32) -> (i32, i32) {
    %c0_i32 = arith.constant 0 : i32
    %c0_i32_0 = arith.constant 0 : i32
    return %arg0, %c0_i32 : i32, i32
  }
  func.func @transform_1(%arg0: i32) -> (i32, i32) {
    %c0_i32 = arith.constant 0 : i32
    %c0_i32_0 = arith.constant 0 : i32
    %c0_i32_1 = arith.constant 0 : i32
    return %c0_i32, %c0_i32_0 : i32, i32
  }
  func.func @transform_2(%arg0: i32) -> (i32, i32) {
    %c0_i32 = arith.constant 0 : i32
    %c0_i32_0 = arith.constant 0 : i32
    %c0_i32_1 = arith.constant 0 : i32
    return %c0_i32, %c0_i32_0 : i32, i32
  }
  func.func @transform_3(%arg0: i32) -> (i32, i32) {
    %c0_i32 = arith.constant 0 : i32
    %c0_i32_0 = arith.constant 0 : i32
    %c0_i32_1 = arith.constant 0 : i32
    return %c0_i32, %c0_i32_0 : i32, i32
  }
  func.func @transform_4(%arg0: i32) -> (i32, i32) {
    %c0_i32 = arith.constant 0 : i32
    %c0_i32_0 = arith.constant 0 : i32
    %c0_i32_1 = arith.constant 0 : i32
    return %c0_i32, %c0_i32_0 : i32, i32
  }
  func.func @transform_5(%arg0: i32) -> (i32, i32) {
    %c0_i32 = arith.constant 0 : i32
    %c0_i32_0 = arith.constant 0 : i32
    %c0_i32_1 = arith.constant 0 : i32
    return %c0_i32, %c0_i32_0 : i32, i32
  }
  func.func @transform_6(%arg0: i32) -> (i32, i32) {
    %c0_i32 = arith.constant 0 : i32
    %c0_i32_0 = arith.constant 0 : i32
    %c0_i32_1 = arith.constant 0 : i32
    return %c0_i32, %c0_i32_0 : i32, i32
  }
  func.func @transform_7(%arg0: i32) -> (i32, i32) {
    %c0_i32 = arith.constant 0 : i32
    %c0_i32_0 = arith.constant 0 : i32
    %c0_i32_1 = arith.constant 0 : i32
    return %c0_i32, %c0_i32_0 : i32, i32
  }
  func.func @transform_8(%arg0: i32) -> (i32, i32) {
    %c0_i32 = arith.constant 0 : i32
    %c0_i32_0 = arith.constant 0 : i32
    %c0_i32_1 = arith.constant 0 : i32
    return %c0_i32, %c0_i32_0 : i32, i32
  }
  func.func @transform_9(%arg0: i32) -> (i32, i32) {
    %c0_i32 = arith.constant 0 : i32
    %c0_i32_0 = arith.constant 0 : i32
    %c0_i32_1 = arith.constant 0 : i32
    return %c0_i32, %c0_i32_0 : i32, i32
  }
  func.func @transform_10(%arg0: i32) -> (i32, i32) {
    %c0_i32 = arith.constant 0 : i32
    %c0_i32_0 = arith.constant 0 : i32
    %c0_i32_1 = arith.constant 0 : i32
    return %c0_i32, %c0_i32_0 : i32, i32
  }
  func.func @transform_11(%arg0: i32) -> (i32, i32) {
    %c0_i32 = arith.constant 0 : i32
    %c0_i32_0 = arith.constant 0 : i32
    return %arg0, %c0_i32 : i32, i32
  }
}

</mosaic_0001>

<bundles_post_ra>
// kernel: mlp_forward.1
= control target key start
LH: loop header
LB: loop body
LE: loop exit
PB: predicated region body
PF: predicated region fallthrough
CT: control target
= control target key end

     0   :  { %16 = vsyncpa [#allocation3], 0  ;;  %s7029_s0 = inlined_call_operand.vmem [shape: f32[16,784], index: 0, kind: input, shape index: {}]   ;;  %s7030_s1 = inlined_call_operand.hbm [shape: bf16[784,512], index: 1, kind: input, shape index: {}]   ;;  %s7031_s2 = inlined_call_operand.vmem [shape: f32[1,512], index: 2, kind: input, shape index: {}]   ;;  %s7032_s3 = inlined_call_operand.hbm [shape: bf16[512,512], index: 3, kind: input, shape index: {}]   ;;  %s7033_s4 = inlined_call_operand.vmem [shape: f32[1,512], index: 4, kind: input, shape index: {}]   ;;  %s7034_s5 = inlined_call_operand.hbm [shape: bf16[512,512], index: 5, kind: input, shape index: {}]   ;;  %s7035_s6 = inlined_call_operand.vmem [shape: f32[1,512], index: 6, kind: input, shape index: {}]   ;;  %s7036_s7 = inlined_call_operand.hbm [shape: bf16[512,512], index: 7, kind: input, shape index: {}]   ;;  %s7037_s8 = inlined_call_operand.vmem [shape: f32[1,512], index: 8, kind: input, shape index: {}]   ;;  %s7038_s9 = inlined_call_operand.vmem [shape: bf16[512,128], index: 9, kind: input, shape index: {}]   ;;  %s7039_s10 = inlined_call_operand.vmem [shape: f32[1,128], index: 10, kind: input, shape index: {}]   ;;  %s7040_s11 = inlined_call_operand.vmem [shape: f32[16,128], index: 11, kind: output, shape index: {}]  }
   0x1   :  { %17 = vsyncpa [#allocation5], 0 }
   0x2   :  { %18 = vsyncpa [#allocation8], 0  ;;  %s6693_s17 = smov [#allocation4]   ;;  %s6694_s19 = smov [#allocation2]  }
   0x3   :  { %s40_s18 = sshll.u32 %s6693_s17, 4  ;;  %s26_s20 = sshll.u32 %s6694_s19, 4  ;;  %s41_s18 = int_to_ptr.vmem [resolvable:$true] %s40_s18  ;;  %s6760_s20 = int_to_ptr.vmem [resolvable:$true] %s26_s20 }
   0x4   :  { %s6599_s23 = scalar_lea.hbm %s7032_s3, 16384 }
   0x5   :  { %p6600_p0 = scmp.ne.s32.totalorder %s7032_s3, %s6599_s23  ;;  %p6603_p1 = scmp.lt.u32.totalorder %s6599_s23, %s7032_s3 }
   0x7   :  { %p6605_p2 = pnand %p6603_p1, %p6600_p0 }
   0x9   :  { %6608 = shalt.err (!%p6605_p2)
}
   0xa   :  { %s6609_s28 = scalar_lea.vmem %s41_s18, 16384  ;;  %p6614_p4 = scmp.lt.s32.totalorder %s41_s18, %s41_s18 }
   0xb   :  { %p6610_p3 = scmp.ne.s32.totalorder %s41_s18, %s6609_s28  ;;  %p6615_p5 = scmp.lt.s32.totalorder %s6609_s28, %s6609_s28 }
   0xd   :  { %p6616_p6 = por %p6615_p5, %p6614_p4 }
   0xf   :  { %p6617_p7 = pnand %p6616_p6, %p6610_p3 }
  0x11   :  { %6620 = shalt.err (!%p6617_p7)
}
  0x12   :  { %s6695_s29 = smov 256   ;;  %s6696_s30 = smov 16  }
  0x13   :  { %46 = dma.hbm_to_vmem [thread:$0]  %s7032_s3, 16384, %s41_s18, [#allocation5], %s6695_s29, %s6695_s29, %s6696_s30  }
  0x14   :  { %s6621_s16 = scalar_lea.hbm %s7030_s1, 25088 }
  0x15   :  { %p6622_p8 = scmp.ne.s32.totalorder %s7030_s1, %s6621_s16  ;;  %p6625_p9 = scmp.lt.u32.totalorder %s6621_s16, %s7030_s1 }
  0x17   :  { %p6627_p10 = pnand %p6625_p9, %p6622_p8 }
  0x19   :  { %6630 = shalt.err (!%p6627_p10)
}
  0x1a   :  { %s6631_s23 = scalar_lea.vmem %s6760_s20, 25088  ;;  %p6636_p12 = scmp.lt.s32.totalorder %s6760_s20, %s6760_s20 }
  0x1b   :  { %p6632_p11 = scmp.ne.s32.totalorder %s6760_s20, %s6631_s23  ;;  %p6637_p13 = scmp.lt.s32.totalorder %s6631_s23, %s6631_s23 }
  0x1d   :  { %p6638_p0 = por %p6637_p13, %p6636_p12 }
  0x1f   :  { %p6639_p1 = pnand %p6638_p0, %p6632_p11 }
  0x21   :  { %6642 = shalt.err (!%p6639_p1)
}
  0x22   :  { %32 = dma.hbm_to_vmem [thread:$0]  %s7030_s1, 25088, %s6760_s20, [#allocation3], %s6695_s29, %s6695_s29, %s6696_s30  }
  0x23   :  { %s6697_s24 = smov [#allocation6]   ;;  %s6698_s26 = smov [#allocation7]  }
  0x24   :  { %s54_s25 = sshll.u32 %s6697_s24, 4  ;;  %s68_s27 = sshll.u32 %s6698_s26, 4  ;;  %s55_s25 = int_to_ptr.vmem [resolvable:$true] %s54_s25  ;;  %s6797_s27 = int_to_ptr.vmem [resolvable:$true] %s68_s27 }
  0x25   :  { %s6643_s13 = scalar_lea.hbm %s7034_s5, 16384 }
  0x26   :  { %p6644_p2 = scmp.ne.s32.totalorder %s7034_s5, %s6643_s13  ;;  %p6647_p3 = scmp.lt.u32.totalorder %s6643_s13, %s7034_s5 }
  0x28   :  { %p6649_p4 = pnand %p6647_p3, %p6644_p2 }
  0x2a   :  { %6652 = shalt.err (!%p6649_p4)
}
  0x2b   :  { %s6653_s1 = scalar_lea.vmem %s55_s25, 16384  ;;  %p6658_p6 = scmp.lt.s32.totalorder %s55_s25, %s55_s25 }
  0x2c   :  { %p6654_p5 = scmp.ne.s32.totalorder %s55_s25, %s6653_s1  ;;  %p6659_p7 = scmp.lt.s32.totalorder %s6653_s1, %s6653_s1 }
  0x2e   :  { %p6660_p8 = por %p6659_p7, %p6658_p6 }
  0x30   :  { %p6661_p9 = pnand %p6660_p8, %p6654_p5 }
  0x32   :  { %6664 = shalt.err (!%p6661_p9)
}
  0x33   :  { %60 = dma.hbm_to_vmem [thread:$0]  %s7034_s5, 16384, %s55_s25, [#allocation5], %s6695_s29, %s6695_s29, %s6696_s30  }
  0x34   :  { %s6665_s23 = scalar_lea.hbm %s7036_s7, 16384 }
  0x35   :  { %p6666_p10 = scmp.ne.s32.totalorder %s7036_s7, %s6665_s23  ;;  %p6669_p11 = scmp.lt.u32.totalorder %s6665_s23, %s7036_s7 }
  0x37   :  { %p6671_p12 = pnand %p6669_p11, %p6666_p10 }
  0x39   :  { %6674 = shalt.err (!%p6671_p12)
}
  0x3a   :  { %s6675_s28 = scalar_lea.vmem %s6797_s27, 16384  ;;  %p6680_p0 = scmp.lt.s32.totalorder %s6797_s27, %s6797_s27 }
  0x3b   :  { %p6676_p13 = scmp.ne.s32.totalorder %s6797_s27, %s6675_s28  ;;  %p6681_p1 = scmp.lt.s32.totalorder %s6675_s28, %s6675_s28 }
  0x3d   :  { %p6682_p2 = por %p6681_p1, %p6680_p0 }
  0x3f   :  { %p6683_p3 = pnand %p6682_p2, %p6676_p13 }
  0x41   :  { %6686 = shalt.err (!%p6683_p3)
}
  0x42   :  { %74 = dma.hbm_to_vmem [thread:$0]  %s7036_s7, 16384, %s6797_s27, [#allocation8], %s6695_s29, %s6695_s29, %s6696_s30  }
  0x43   :  { %6687 = dma.done.wait [#allocation3], 25088  }
  0x44   :  { %6688 = vsyncadd [#allocation3], 4294942208 }
  0x45   :  { %6689 = dma.done.wait [#allocation5], 32768  }
  0x46   :  { %6690 = vsyncadd [#allocation5], 4294934528 }
  0x47   :  { %6691 = dma.done.wait [#allocation8], 16384  }
  0x48   :  { %6692 = vsyncadd [#allocation8], 4294950912  ;;  %v5697_v0 = vld [vmem:[#allocation2 + $0x4] ss:$16 sps:$4 sm:$0xff]   ;;  %v5699_v1 = vld [vmem:[#allocation2 + $0xc] ss:$16 sps:$4 sm:$0xff]  }
  0x49   :  { %1317 = vmatprep.subr.bf16.mxu0 %v5697_v0  ;;  %v5701_v2 = vld [vmem:[#allocation2] ss:$16 sps:$4 sm:$0xff]   ;;  %v5702_v3 = vld [vmem:[#allocation2 + $0x8] ss:$16 sps:$4 sm:$0xff]   ;;  %1489 = vmatprep.subr.bf16.mxu1 %v5699_v1  ;;  %v5703_v4 = vld [vmem:[#allocation2 + $0x24] ss:$16 sps:$4 sm:$0xff]  }
  0x4a   :  { %1318 = vmatpush1.bf16.msra.mxu0 %v5701_v2  ;;  %1490 = vmatpush1.bf16.msra.mxu1 %v5702_v3  ;;  %v5705_v5 = vld [vmem:[#allocation2 + $0x2c] ss:$16 sps:$4 sm:$0xff]   ;;  %v5707_v6 = vld [vmem:[#allocation2 + $0x20] ss:$16 sps:$4 sm:$0xff]   ;;  %v5708_v7 = vld [vmem:[#allocation2 + $0x28] ss:$16 sps:$4 sm:$0xff]  }
  0x4b   :  { %1319 = vmatprep.subr.bf16.mxu0 %v5703_v4  ;;  %1491 = vmatprep.subr.bf16.mxu1 %v5705_v5  ;;  %v5709_v8 = vld [vmem:[#allocation2 + $0x44] ss:$16 sps:$4 sm:$0xff]   ;;  %v5711_v9 = vld [vmem:[#allocation2 + $0x4c] ss:$16 sps:$4 sm:$0xff]   ;;  %v5713_v10 = vld [vmem:[#allocation2 + $0x40] ss:$16 sps:$4 sm:$0xff]  }
  0x4c   :  { %v5714_v11 = vld [vmem:[#allocation2 + $0x48] ss:$16 sps:$4 sm:$0xff]   ;;  %v5715_v12 = vld [vmem:[#allocation2 + $0x64] ss:$16 sps:$4 sm:$0xff]   ;;  %v5717_v13 = vld [vmem:[#allocation2 + $0x6c] ss:$16 sps:$4 sm:$0xff]  }
  0x4d   :  { %v5719_v14 = vld [vmem:[#allocation2 + $0x60] ss:$16 sps:$4 sm:$0xff]   ;;  %v5720_v15 = vld [vmem:[#allocation2 + $0x68] ss:$16 sps:$4 sm:$0xff]   ;;  %v5721_v16 = vld [vmem:[#allocation2 + $0x84] ss:$16 sps:$4 sm:$0xff]  }
  0x4e   :  { %1320 = vmatpush1.bf16.msra.mxu0 %v5707_v6  ;;  %1492 = vmatpush1.bf16.msra.mxu1 %v5708_v7  ;;  %v5723_v17 = vld [vmem:[#allocation2 + $0x8c] ss:$16 sps:$4 sm:$0xff]   ;;  %v5725_v18 = vld [vmem:[#allocation2 + $0x80] ss:$16 sps:$4 sm:$0xff]   ;;  %v5726_v19 = vld [vmem:[#allocation2 + $0x88] ss:$16 sps:$4 sm:$0xff]  }
  0x4f   :  { %1321 = vmatprep.subr.bf16.mxu0 %v5709_v8  ;;  %1493 = vmatprep.subr.bf16.mxu1 %v5711_v9  ;;  %v5727_v20 = vld [vmem:[#allocation2 + $0xa4] ss:$16 sps:$4 sm:$0xff]   ;;  %v5729_v21 = vld [vmem:[#allocation2 + $0xac] ss:$16 sps:$4 sm:$0xff]   ;;  %v5731_v22 = vld [vmem:[#allocation2 + $0xa0] ss:$16 sps:$4 sm:$0xff]  }
  0x50   :  { %v5732_v23 = vld [vmem:[#allocation2 + $0xa8] ss:$16 sps:$4 sm:$0xff]   ;;  %v5733_v24 = vld [vmem:[#allocation2 + $0xc4] ss:$16 sps:$4 sm:$0xff]   ;;  %v5735_v25 = vld [vmem:[#allocation2 + $0xcc] ss:$16 sps:$4 sm:$0xff]  }
  0x51   :  { %v5737_v26 = vld [vmem:[#allocation2 + $0xc0] ss:$16 sps:$4 sm:$0xff]   ;;  %v5738_v27 = vld [vmem:[#allocation2 + $0xc8] ss:$16 sps:$4 sm:$0xff]   ;;  %v5739_v28 = vld [vmem:[#allocation2 + $0xe4] ss:$16 sps:$4 sm:$0xff]  }
  0x52   :  { %1322 = vmatpush1.bf16.msra.mxu0 %v5713_v10  ;;  %1494 = vmatpush1.bf16.msra.mxu1 %v5714_v11  ;;  %v5741_v29 = vld [vmem:[#allocation2 + $0xec] ss:$16 sps:$4 sm:$0xff]   ;;  %v5743_v30 = vld [vmem:[#allocation2 + $0xe0] ss:$16 sps:$4 sm:$0xff]   ;;  %v5744_v31 = vld [vmem:[#allocation2 + $0xe8] ss:$16 sps:$4 sm:$0xff]  }
  0x53   :  { %1323 = vmatprep.subr.bf16.mxu0 %v5715_v12  ;;  %1495 = vmatprep.subr.bf16.mxu1 %v5717_v13  ;;  %v5745_v32 = vld [vmem:[#allocation2 + $0x104] ss:$16 sps:$4 sm:$0xff]   ;;  %v5747_v33 = vld [vmem:[#allocation2 + $0x10c] ss:$16 sps:$4 sm:$0xff]   ;;  %v5749_v34 = vld [vmem:[#allocation2 + $0x100] ss:$16 sps:$4 sm:$0xff]  }
  0x54   :  { %v5750_v35 = vld [vmem:[#allocation2 + $0x108] ss:$16 sps:$4 sm:$0xff]   ;;  %v5751_v36 = vld [vmem:[#allocation2 + $0x124] ss:$16 sps:$4 sm:$0xff]   ;;  %v5753_v37 = vld [vmem:[#allocation2 + $0x12c] ss:$16 sps:$4 sm:$0xff]  }
  0x55   :  { %v5755_v38 = vld [vmem:[#allocation2 + $0x120] ss:$16 sps:$4 sm:$0xff]   ;;  %v5756_v39 = vld [vmem:[#allocation2 + $0x128] ss:$16 sps:$4 sm:$0xff]   ;;  %v5757_v40 = vld [vmem:[#allocation2 + $0x144] ss:$16 sps:$4 sm:$0xff]  }
  0x56   :  { %1324 = vmatpush1.bf16.msra.mxu0 %v5719_v14  ;;  %1496 = vmatpush1.bf16.msra.mxu1 %v5720_v15  ;;  %v5759_v41 = vld [vmem:[#allocation2 + $0x14c] ss:$16 sps:$4 sm:$0xff]   ;;  %v5761_v42 = vld [vmem:[#allocation2 + $0x140] ss:$16 sps:$4 sm:$0xff]   ;;  %v5762_v43 = vld [vmem:[#allocation2 + $0x148] ss:$16 sps:$4 sm:$0xff]  }
  0x57   :  { %1325 = vmatprep.subr.bf16.mxu0 %v5721_v16  ;;  %1497 = vmatprep.subr.bf16.mxu1 %v5723_v17  ;;  %v5763_v44 = vld [vmem:[#allocation2 + $0x164] ss:$16 sps:$4 sm:$0xff]   ;;  %v5765_v45 = vld [vmem:[#allocation2 + $0x16c] ss:$16 sps:$4 sm:$0xff]   ;;  %v5767_v48 = vld [vmem:[#allocation2 + $0x160] ss:$16 sps:$4 sm:$0xff]  }
  0x58   :  { %v95_v46 = vld [vmem:[%s7029_s0 + $0x8] sm:$0xff]  ;;  %v102_v47 = vld [vmem:[%s7029_s0 + $0x40] sm:$0xff]  ;;  %v101_v5 = vld [vmem:[%s7029_s0 + $0x38] sm:$0xff]  ;;  %vm1313_vm0 = vcmask 130048  }
  0x59   :  { %v5768_v49 = vld [vmem:[#allocation2 + $0x168] ss:$16 sps:$4 sm:$0xff]   ;;  %v109_v50 = vpack.c.bf16 %v102_v47, %v95_v46  ;;  %v5769_v51 = vld [vmem:[#allocation2 + $0x184] ss:$16 sps:$4 sm:$0xff]   ;;  %v5771_v52 = vld [vmem:[#allocation2 + $0x18c] ss:$16 sps:$4 sm:$0xff]  }
  0x5a   :  { %1326 = vmatpush1.bf16.msra.mxu0 %v5725_v18  ;;  %1498 = vmatpush1.bf16.msra.mxu1 %v5726_v19  ;;  %v5773_v53 = vld [vmem:[#allocation2 + $0x180] ss:$16 sps:$4 sm:$0xff]   ;;  %v5774_v54 = vld [vmem:[#allocation2 + $0x188] ss:$16 sps:$4 sm:$0xff]   ;;  %v5775_v55 = vld [vmem:[#allocation2 + $0x1a4] ss:$16 sps:$4 sm:$0xff]  }
  0x5b   :  { %1327 = vmatprep.subr.bf16.mxu0 %v5727_v20  ;;  %1499 = vmatprep.subr.bf16.mxu1 %v5729_v21  ;;  %v5777_v56 = vld [vmem:[#allocation2 + $0x1ac] ss:$16 sps:$4 sm:$0xff]   ;;  %v5779_v57 = vld [vmem:[#allocation2 + $0x1a0] ss:$16 sps:$4 sm:$0xff]   ;;  %v5780_v58 = vld [vmem:[#allocation2 + $0x1a8] ss:$16 sps:$4 sm:$0xff]  }
  0x5c   :  { %1349 = vmatprep.mubr.bf16.mxu0 %v109_v50  ;;  %1521 = vmatprep.mubr.bf16.mxu1 %v109_v50  ;;  %v5781_v59 = vld [vmem:[#allocation2 + $0x1c4] ss:$16 sps:$4 sm:$0xff]   ;;  %v5783_v60 = vld [vmem:[#allocation2 + $0x1cc] ss:$16 sps:$4 sm:$0xff]   ;;  %v5785_v61 = vld [vmem:[#allocation2 + $0x1c0] ss:$16 sps:$4 sm:$0xff]  }
  0x5d   :  { %v5786_v62 = vld [vmem:[#allocation2 + $0x1c8] ss:$16 sps:$4 sm:$0xff]   ;;  %v5787_v63 = vld [vmem:[#allocation2 + $0x1e4] ss:$16 sps:$4 sm:$0xff]   ;;  %v5789_v0 = vld [vmem:[#allocation2 + $0x1ec] ss:$16 sps:$4 sm:$0xff]  }
  0x5e   :  { %1328 = vmatpush1.bf16.msra.mxu0 %v5731_v22  ;;  %1500 = vmatpush1.bf16.msra.mxu1 %v5732_v23  ;;  %v5791_v1 = vld [vmem:[#allocation2 + $0x1e0] ss:$16 sps:$4 sm:$0xff]   ;;  %v5792_v2 = vld [vmem:[#allocation2 + $0x1e8] ss:$16 sps:$4 sm:$0xff]   ;;  %v5795_v3 = vld [vmem:[#allocation2 + $0x204] ss:$16 sps:$4 sm:$0xff]  }
  0x5f   :  { %1329 = vmatprep.subr.bf16.mxu0 %v5733_v24  ;;  %1501 = vmatprep.subr.bf16.mxu1 %v5735_v25  ;;  %v94_v4 = vld [vmem:[%s7029_s0] sm:$0xff]  ;;  %v5798_v6 = vld [vmem:[#allocation2 + $0x20c] ss:$16 sps:$4 sm:$0xff]   ;;  %v5796_v8 = vld [vmem:[#allocation2 + $0x208] ss:$16 sps:$4 sm:$0xff]  }
  0x60   :  { %v5793_v7 = vld [vmem:[#allocation2 + $0x200] ss:$16 sps:$4 sm:$0xff]   ;;  %v108_v9 = vpack.c.bf16 %v101_v5, %v94_v4  ;;  %v5801_v10 = vld [vmem:[#allocation2 + $0x224] ss:$16 sps:$4 sm:$0xff]   ;;  %v5804_v11 = vld [vmem:[#allocation2 + $0x22c] ss:$16 sps:$4 sm:$0xff]  }
  0x61   :  { %v5799_v12 = vld [vmem:[#allocation2 + $0x220] ss:$16 sps:$4 sm:$0xff]   ;;  %v5802_v13 = vld [vmem:[#allocation2 + $0x228] ss:$16 sps:$4 sm:$0xff]   ;;  %v5807_v14 = vld [vmem:[#allocation2 + $0x244] ss:$16 sps:$4 sm:$0xff]  }
  0x62   :  { %1330 = vmatpush1.bf16.msra.mxu0 %v5737_v26  ;;  %1502 = vmatpush1.bf16.msra.mxu1 %v5738_v27  ;;  %v5810_v15 = vld [vmem:[#allocation2 + $0x24c] ss:$16 sps:$4 sm:$0xff]   ;;  %v5805_v16 = vld [vmem:[#allocation2 + $0x240] ss:$16 sps:$4 sm:$0xff]   ;;  %v5808_v17 = vld [vmem:[#allocation2 + $0x248] ss:$16 sps:$4 sm:$0xff]  }
  0x63   :  { %1331 = vmatprep.subr.bf16.mxu0 %v5739_v28  ;;  %1503 = vmatprep.subr.bf16.mxu1 %v5741_v29  ;;  %v5813_v18 = vld [vmem:[#allocation2 + $0x264] ss:$16 sps:$4 sm:$0xff]   ;;  %v5816_v19 = vld [vmem:[#allocation2 + $0x26c] ss:$16 sps:$4 sm:$0xff]   ;;  %v5811_v20 = vld [vmem:[#allocation2 + $0x260] ss:$16 sps:$4 sm:$0xff]  }
  0x64   :  { %v5814_v21 = vld [vmem:[#allocation2 + $0x268] ss:$16 sps:$4 sm:$0xff]   ;;  %v5819_v22 = vld [vmem:[#allocation2 + $0x284] ss:$16 sps:$4 sm:$0xff]   ;;  %v5822_v23 = vld [vmem:[#allocation2 + $0x28c] ss:$16 sps:$4 sm:$0xff]  }
  0x65   :  { %v5817_v24 = vld [vmem:[#allocation2 + $0x280] ss:$16 sps:$4 sm:$0xff]   ;;  %v5820_v25 = vld [vmem:[#allocation2 + $0x288] ss:$16 sps:$4 sm:$0xff]   ;;  %v5825_v26 = vld [vmem:[#allocation2 + $0x2a4] ss:$16 sps:$4 sm:$0xff]  }
  0x66   :  { %1332 = vmatpush1.bf16.msra.mxu0 %v5743_v30  ;;  %1504 = vmatpush1.bf16.msra.mxu1 %v5744_v31  ;;  %v5828_v27 = vld [vmem:[#allocation2 + $0x2ac] ss:$16 sps:$4 sm:$0xff]   ;;  %v5823_v28 = vld [vmem:[#allocation2 + $0x2a0] ss:$16 sps:$4 sm:$0xff]   ;;  %v5826_v29 = vld [vmem:[#allocation2 + $0x2a8] ss:$16 sps:$4 sm:$0xff]  }
  0x67   :  { %1333 = vmatprep.subr.bf16.mxu0 %v5745_v32  ;;  %1505 = vmatprep.subr.bf16.mxu1 %v5747_v33  ;;  %v5831_v30 = vld [vmem:[#allocation2 + $0x2c4] ss:$16 sps:$4 sm:$0xff]   ;;  %v5834_v31 = vld [vmem:[#allocation2 + $0x2cc] ss:$16 sps:$4 sm:$0xff]   ;;  %v5847_v47 = vld [vmem:[#allocation2 + $0x320] ss:$16 sps:$4 sm:$0xff]  }
  0x68   :  { %v97_v32 = vld [vmem:[%s7029_s0 + $0x18] sm:$0xff]  ;;  %v104_v33 = vld [vmem:[%s7029_s0 + $0x50] sm:$0xff] }
  0x69   :  { %v5852_v46 = vld [vmem:[#allocation2 + $0x32c] ss:$16 sps:$4 sm:$0xff]   ;;  %v5880_v4 = vld [vmem:[#allocation2 + $0x3c8] ss:$16 sps:$4 sm:$0xff]   ;;  %v5885_v5 = vld [vmem:[#allocation2 + $0x3e4] ss:$16 sps:$4 sm:$0xff]  }
  0x6a   :  { %1334 = vmatpush1.bf16.msra.mxu0 %v5749_v34  ;;  %1506 = vmatpush1.bf16.msra.mxu1 %v5750_v35  ;;  %v5829_v34 = vld [vmem:[#allocation2 + $0x2c0] ss:$16 sps:$4 sm:$0xff]   ;;  %v5832_v35 = vld [vmem:[#allocation2 + $0x2c8] ss:$16 sps:$4 sm:$0xff]   ;;  %v5858_v50 = vld [vmem:[#allocation2 + $0x34c] ss:$16 sps:$4 sm:$0xff]  }
  0x6b   :  { %1335 = vmatprep.subr.bf16.mxu0 %v5751_v36  ;;  %1507 = vmatprep.subr.bf16.mxu1 %v5753_v37  ;;  %v111_v36 = vpack.c.bf16 %v104_v33, %v97_v32  ;;  %v5837_v37 = vld [vmem:[#allocation2 + $0x2e4] ss:$16 sps:$4 sm:$0xff]   ;;  %v5918_v32 = vld [vmem:[#allocation2 + $0x48c] ss:$16 sps:$4 sm:$0xff]   ;;  %v5913_v33 = vld [vmem:[#allocation2 + $0x480] ss:$16 sps:$4 sm:$0xff]  }
  0x6e   :  { %1336 = vmatpush1.bf16.msra.mxu0 %v5755_v38  ;;  %1508 = vmatpush1.bf16.msra.mxu1 %v5756_v39  ;;  %v5840_v38 = vld [vmem:[#allocation2 + $0x2ec] ss:$16 sps:$4 sm:$0xff]   ;;  %v5835_v39 = vld [vmem:[#allocation2 + $0x2e0] ss:$16 sps:$4 sm:$0xff]  }
  0x6f   :  { %1337 = vmatprep.subr.bf16.mxu0 %v5757_v40  ;;  %1509 = vmatprep.subr.bf16.mxu1 %v5759_v41  ;;  %v5838_v40 = vld [vmem:[#allocation2 + $0x2e8] ss:$16 sps:$4 sm:$0xff]   ;;  %v5843_v41 = vld [vmem:[#allocation2 + $0x304] ss:$16 sps:$4 sm:$0xff]  }
  0x72   :  { %1338 = vmatpush1.bf16.msra.mxu0 %v5761_v42  ;;  %1510 = vmatpush1.bf16.msra.mxu1 %v5762_v43  ;;  %v5846_v42 = vld [vmem:[#allocation2 + $0x30c] ss:$16 sps:$4 sm:$0xff]   ;;  %v5841_v43 = vld [vmem:[#allocation2 + $0x300] ss:$16 sps:$4 sm:$0xff]  }
  0x73   :  { %1339 = vmatprep.subr.bf16.mxu0 %v5763_v44  ;;  %1511 = vmatprep.subr.bf16.mxu1 %v5765_v45  ;;  %v5844_v44 = vld [vmem:[#allocation2 + $0x308] ss:$16 sps:$4 sm:$0xff]   ;;  %v5849_v45 = vld [vmem:[#allocation2 + $0x324] ss:$16 sps:$4 sm:$0xff]  }
  0x76   :  { %1340 = vmatpush1.bf16.msra.mxu0 %v5767_v48  ;;  %1512 = vmatpush1.bf16.msra.mxu1 %v5768_v49  ;;  %v5850_v48 = vld [vmem:[#allocation2 + $0x328] ss:$16 sps:$4 sm:$0xff]   ;;  %v5855_v49 = vld [vmem:[#allocation2 + $0x344] ss:$16 sps:$4 sm:$0xff]  }
  0x77   :  { %1341 = vmatprep.subr.bf16.mxu0 %v5769_v51  ;;  %1513 = vmatprep.subr.bf16.mxu1 %v5771_v52  ;;  %v5853_v51 = vld [vmem:[#allocation2 + $0x340] ss:$16 sps:$4 sm:$0xff]   ;;  %v5856_v52 = vld [vmem:[#allocation2 + $0x348] ss:$16 sps:$4 sm:$0xff]  }
  0x7a   :  { %1342 = vmatpush1.bf16.msra.mxu0 %v5773_v53  ;;  %1514 = vmatpush1.bf16.msra.mxu1 %v5774_v54  ;;  %v5861_v53 = vld [vmem:[#allocation2 + $0x364] ss:$16 sps:$4 sm:$0xff]   ;;  %v5864_v54 = vld [vmem:[#allocation2 + $0x36c] ss:$16 sps:$4 sm:$0xff]  }
  0x7b   :  { %1343 = vmatprep.subr.bf16.mxu0 %v5775_v55  ;;  %1515 = vmatprep.subr.bf16.mxu1 %v5777_v56  ;;  %v5859_v55 = vld [vmem:[#allocation2 + $0x360] ss:$16 sps:$4 sm:$0xff]   ;;  %v5862_v56 = vld [vmem:[#allocation2 + $0x368] ss:$16 sps:$4 sm:$0xff]  }
  0x7e   :  { %1344 = vmatpush1.bf16.msra.mxu0 %v5779_v57  ;;  %1516 = vmatpush1.bf16.msra.mxu1 %v5780_v58  ;;  %v5867_v57 = vld [vmem:[#allocation2 + $0x384] ss:$16 sps:$4 sm:$0xff]   ;;  %v5870_v58 = vld [vmem:[#allocation2 + $0x38c] ss:$16 sps:$4 sm:$0xff]  }
  0x7f   :  { %1345 = vmatprep.subr.bf16.mxu0 %v5781_v59  ;;  %1517 = vmatprep.subr.bf16.mxu1 %v5783_v60  ;;  %v5865_v59 = vld [vmem:[#allocation2 + $0x380] ss:$16 sps:$4 sm:$0xff]   ;;  %v5868_v60 = vld [vmem:[#allocation2 + $0x388] ss:$16 sps:$4 sm:$0xff]  }
  0x82   :  { %1346 = vmatpush1.bf16.msra.mxu0 %v5785_v61  ;;  %1518 = vmatpush1.bf16.msra.mxu1 %v5786_v62  ;;  %v5873_v61 = vld [vmem:[#allocation2 + $0x3a4] ss:$16 sps:$4 sm:$0xff]   ;;  %v5876_v62 = vld [vmem:[#allocation2 + $0x3ac] ss:$16 sps:$4 sm:$0xff]  }
  0x83   :  { %1347 = vmatprep.subr.bf16.mxu0 %v5787_v63  ;;  %1519 = vmatprep.subr.bf16.mxu1 %v5789_v0  ;;  %v5871_v63 = vld [vmem:[#allocation2 + $0x3a0] ss:$16 sps:$4 sm:$0xff]   ;;  %v5874_v0 = vld [vmem:[#allocation2 + $0x3a8] ss:$16 sps:$4 sm:$0xff]  }
  0x86   :  { %1348 = vmatpush1.bf16.msra.mxu0 %v5791_v1  ;;  %1520 = vmatpush1.bf16.msra.mxu1 %v5792_v2  ;;  %v5879_v1 = vld [vmem:[#allocation2 + $0x3c4] ss:$16 sps:$4 sm:$0xff]   ;;  %v5882_v2 = vld [vmem:[#allocation2 + $0x3cc] ss:$16 sps:$4 sm:$0xff]  }
  0x87   :  { %1360 = vmatprep.subr.bf16.mxu0 %v5795_v3  ;;  %1532 = vmatprep.subr.bf16.mxu1 %v5798_v6  ;;  %v5877_v3 = vld [vmem:[#allocation2 + $0x3c0] ss:$16 sps:$4 sm:$0xff]   ;;  %v5888_v6 = vld [vmem:[#allocation2 + $0x3ec] ss:$16 sps:$4 sm:$0xff]  }
  0x89   :  { %1350 = vmatmul.mubr.bf16.vlgmr.msra.gmra.mrb[0].mxu0 %v108_v9  ;;  %1522 = vmatmul.mubr.bf16.vlgmr.msra.gmra.mrb[0].mxu1 %v108_v9  ;;  %v5891_v9 = vld [vmem:[#allocation2 + $0x404] ss:$16 sps:$4 sm:$0xff]  }
  0x8a   :  { %1361 = vmatpush1.bf16.msra.mxu0 %v5793_v7  ;;  %1533 = vmatpush1.bf16.msra.mxu1 %v5796_v8  ;;  %v5883_v7 = vld [vmem:[#allocation2 + $0x3e0] ss:$16 sps:$4 sm:$0xff]   ;;  %v5886_v8 = vld [vmem:[#allocation2 + $0x3e8] ss:$16 sps:$4 sm:$0xff]  }
  0x8b   :  { %1362 = vmatprep.subr.bf16.mxu0 %v5801_v10  ;;  %1534 = vmatprep.subr.bf16.mxu1 %v5804_v11  ;;  %v96_v10 = vld [vmem:[%s7029_s0 + $0x10] sm:$0xff]  ;;  %v103_v11 = vld [vmem:[%s7029_s0 + $0x48] sm:$0xff] }
  0x8c   :  { %1392 = vmatprep.mubr.bf16.mxu0 %v111_v36  ;;  %1564 = vmatprep.mubr.bf16.mxu1 %v111_v36  ;;  %v5924_v36 = vld [vmem:[#allocation2 + $0x4ac] ss:$16 sps:$4 sm:$0xff]  }
  0x8e   :  { %1363 = vmatpush1.bf16.msra.mxu0 %v5799_v12  ;;  %1535 = vmatpush1.bf16.msra.mxu1 %v5802_v13  ;;  %v5894_v12 = vld [vmem:[#allocation2 + $0x40c] ss:$16 sps:$4 sm:$0xff]   ;;  %v5889_v13 = vld [vmem:[#allocation2 + $0x400] ss:$16 sps:$4 sm:$0xff]  }
  0x8f   :  { %1364 = vmatprep.subr.bf16.mxu0 %v5807_v14  ;;  %1536 = vmatprep.subr.bf16.mxu1 %v5810_v15  ;;  %v5892_v14 = vld [vmem:[#allocation2 + $0x408] ss:$16 sps:$4 sm:$0xff]   ;;  %v110_v15 = vpack.c.bf16 %v103_v11, %v96_v10  ;;  %v5981_v11 = vld [vmem:[#allocation2 + $0x5e4] ss:$16 sps:$4 sm:$0xff]  }
  0x90   :  { %v5976_v10 = vld [vmem:[#allocation2 + $0x5c8] ss:$16 sps:$4 sm:$0xff]  }
  0x92   :  { %1365 = vmatpush1.bf16.msra.mxu0 %v5805_v16  ;;  %1537 = vmatpush1.bf16.msra.mxu1 %v5808_v17  ;;  %v5897_v16 = vld [vmem:[#allocation2 + $0x424] ss:$16 sps:$4 sm:$0xff]   ;;  %v5900_v17 = vld [vmem:[#allocation2 + $0x42c] ss:$16 sps:$4 sm:$0xff]  }
  0x93   :  { %1366 = vmatprep.subr.bf16.mxu0 %v5813_v18  ;;  %1538 = vmatprep.subr.bf16.mxu1 %v5816_v19  ;;  %v99_v18 = vld [vmem:[%s7029_s0 + $0x28] sm:$0xff]  ;;  %v5895_v19 = vld [vmem:[#allocation2 + $0x420] ss:$16 sps:$4 sm:$0xff]  }
  0x96   :  { %1367 = vmatpush1.bf16.msra.mxu0 %v5811_v20  ;;  %1539 = vmatpush1.bf16.msra.mxu1 %v5814_v21  ;;  %v5898_v20 = vld [vmem:[#allocation2 + $0x428] ss:$16 sps:$4 sm:$0xff]   ;;  %v106_v21 = vld [vmem:[%s7029_s0 + $0x60] sm:$0xff] }
  0x97   :  { %1368 = vmatprep.subr.bf16.mxu0 %v5819_v22  ;;  %1540 = vmatprep.subr.bf16.mxu1 %v5822_v23  ;;  %v5903_v22 = vld [vmem:[#allocation2 + $0x444] ss:$16 sps:$4 sm:$0xff]   ;;  %v113_v23 = vpack.c.bf16 %v106_v21, %v99_v18  ;;  %v5990_v18 = vld [vmem:[#allocation2 + $0x60c] ss:$16 sps:$4 sm:$0xff]  }
  0x9a   :  { %1369 = vmatpush1.bf16.msra.mxu0 %v5817_v24  ;;  %1541 = vmatpush1.bf16.msra.mxu1 %v5820_v25  ;;  %v5906_v24 = vld [vmem:[#allocation2 + $0x44c] ss:$16 sps:$4 sm:$0xff]   ;;  %v5901_v25 = vld [vmem:[#allocation2 + $0x440] ss:$16 sps:$4 sm:$0xff]  }
  0x9b   :  { %1370 = vmatprep.subr.bf16.mxu0 %v5825_v26  ;;  %1542 = vmatprep.subr.bf16.mxu1 %v5828_v27  ;;  %v5904_v26 = vld [vmem:[#allocation2 + $0x448] ss:$16 sps:$4 sm:$0xff]   ;;  %v5909_v27 = vld [vmem:[#allocation2 + $0x464] ss:$16 sps:$4 sm:$0xff]  }
  0x9e   :  { %1371 = vmatpush1.bf16.msra.mxu0 %v5823_v28  ;;  %1543 = vmatpush1.bf16.msra.mxu1 %v5826_v29  ;;  %v5912_v28 = vld [vmem:[#allocation2 + $0x46c] ss:$16 sps:$4 sm:$0xff]   ;;  %v5907_v29 = vld [vmem:[#allocation2 + $0x460] ss:$16 sps:$4 sm:$0xff]  }
  0x9f   :  { %1372 = vmatprep.subr.bf16.mxu0 %v5831_v30  ;;  %1544 = vmatprep.subr.bf16.mxu1 %v5834_v31  ;;  %v5910_v30 = vld [vmem:[#allocation2 + $0x468] ss:$16 sps:$4 sm:$0xff]   ;;  %v5915_v31 = vld [vmem:[#allocation2 + $0x484] ss:$16 sps:$4 sm:$0xff]  }
  0xa2   :  { %1373 = vmatpush1.bf16.msra.mxu0 %v5829_v34  ;;  %1545 = vmatpush1.bf16.msra.mxu1 %v5832_v35  ;;  %v5916_v34 = vld [vmem:[#allocation2 + $0x488] ss:$16 sps:$4 sm:$0xff]   ;;  %v5921_v35 = vld [vmem:[#allocation2 + $0x4a4] ss:$16 sps:$4 sm:$0xff]  }
  0xa3   :  { %1374 = vmatprep.subr.bf16.mxu0 %v5837_v37  ;;  %1546 = vmatprep.subr.bf16.mxu1 %v5840_v38  ;;  %v5919_v37 = vld [vmem:[#allocation2 + $0x4a0] ss:$16 sps:$4 sm:$0xff]   ;;  %v5922_v38 = vld [vmem:[#allocation2 + $0x4a8] ss:$16 sps:$4 sm:$0xff]  }
  0xa6   :  { %1375 = vmatpush1.bf16.msra.mxu0 %v5835_v39  ;;  %1547 = vmatpush1.bf16.msra.mxu1 %v5838_v40  ;;  %v5927_v39 = vld [vmem:[#allocation2 + $0x4c4] ss:$16 sps:$4 sm:$0xff]   ;;  %v5930_v40 = vld [vmem:[#allocation2 + $0x4cc] ss:$16 sps:$4 sm:$0xff]  }
  0xa7   :  { %1376 = vmatprep.subr.bf16.mxu0 %v5843_v41  ;;  %1548 = vmatprep.subr.bf16.mxu1 %v5846_v42  ;;  %v5925_v41 = vld [vmem:[#allocation2 + $0x4c0] ss:$16 sps:$4 sm:$0xff]   ;;  %v5928_v42 = vld [vmem:[#allocation2 + $0x4c8] ss:$16 sps:$4 sm:$0xff]  }
  0xaa   :  { %1377 = vmatpush1.bf16.msra.mxu0 %v5841_v43  ;;  %1549 = vmatpush1.bf16.msra.mxu1 %v5844_v44  ;;  %v5933_v43 = vld [vmem:[#allocation2 + $0x4e4] ss:$16 sps:$4 sm:$0xff]   ;;  %v5936_v44 = vld [vmem:[#allocation2 + $0x4ec] ss:$16 sps:$4 sm:$0xff]  }
  0xab   :  { %1378 = vmatprep.subr.bf16.mxu0 %v5849_v45  ;;  %1550 = vmatprep.subr.bf16.mxu1 %v5852_v46  ;;  %v5931_v45 = vld [vmem:[#allocation2 + $0x4e0] ss:$16 sps:$4 sm:$0xff]   ;;  %v5934_v46 = vld [vmem:[#allocation2 + $0x4e8] ss:$16 sps:$4 sm:$0xff]  }
  0xae   :  { %1379 = vmatpush1.bf16.msra.mxu0 %v5847_v47  ;;  %1551 = vmatpush1.bf16.msra.mxu1 %v5850_v48  ;;  %v5939_v47 = vld [vmem:[#allocation2 + $0x504] ss:$16 sps:$4 sm:$0xff]   ;;  %v5942_v48 = vld [vmem:[#allocation2 + $0x50c] ss:$16 sps:$4 sm:$0xff]  }
  0xaf   :  { %1380 = vmatprep.subr.bf16.mxu0 %v5855_v49  ;;  %1552 = vmatprep.subr.bf16.mxu1 %v5858_v50  ;;  %v5937_v49 = vld [vmem:[#allocation2 + $0x500] ss:$16 sps:$4 sm:$0xff]   ;;  %v5940_v50 = vld [vmem:[#allocation2 + $0x508] ss:$16 sps:$4 sm:$0xff]  }
  0xb2   :  { %1381 = vmatpush1.bf16.msra.mxu0 %v5853_v51  ;;  %1553 = vmatpush1.bf16.msra.mxu1 %v5856_v52  ;;  %v5945_v51 = vld [vmem:[#allocation2 + $0x524] ss:$16 sps:$4 sm:$0xff]   ;;  %v5948_v52 = vld [vmem:[#allocation2 + $0x52c] ss:$16 sps:$4 sm:$0xff]  }
  0xb3   :  { %1382 = vmatprep.subr.bf16.mxu0 %v5861_v53  ;;  %1554 = vmatprep.subr.bf16.mxu1 %v5864_v54  ;;  %v5943_v53 = vld [vmem:[#allocation2 + $0x520] ss:$16 sps:$4 sm:$0xff]   ;;  %v5946_v54 = vld [vmem:[#allocation2 + $0x528] ss:$16 sps:$4 sm:$0xff]  }
  0xb6   :  { %1383 = vmatpush1.bf16.msra.mxu0 %v5859_v55  ;;  %1555 = vmatpush1.bf16.msra.mxu1 %v5862_v56  ;;  %v5951_v55 = vld [vmem:[#allocation2 + $0x544] ss:$16 sps:$4 sm:$0xff]   ;;  %v5954_v56 = vld [vmem:[#allocation2 + $0x54c] ss:$16 sps:$4 sm:$0xff]  }
  0xb7   :  { %1384 = vmatprep.subr.bf16.mxu0 %v5867_v57  ;;  %1556 = vmatprep.subr.bf16.mxu1 %v5870_v58  ;;  %v5949_v57 = vld [vmem:[#allocation2 + $0x540] ss:$16 sps:$4 sm:$0xff]   ;;  %v5952_v58 = vld [vmem:[#allocation2 + $0x548] ss:$16 sps:$4 sm:$0xff]  }
  0xba   :  { %1385 = vmatpush1.bf16.msra.mxu0 %v5865_v59  ;;  %1557 = vmatpush1.bf16.msra.mxu1 %v5868_v60  ;;  %v5957_v59 = vld [vmem:[#allocation2 + $0x564] ss:$16 sps:$4 sm:$0xff]   ;;  %v5960_v60 = vld [vmem:[#allocation2 + $0x56c] ss:$16 sps:$4 sm:$0xff]  }
  0xbb   :  { %1386 = vmatprep.subr.bf16.mxu0 %v5873_v61  ;;  %1558 = vmatprep.subr.bf16.mxu1 %v5876_v62  ;;  %v5955_v61 = vld [vmem:[#allocation2 + $0x560] ss:$16 sps:$4 sm:$0xff]   ;;  %v5958_v62 = vld [vmem:[#allocation2 + $0x568] ss:$16 sps:$4 sm:$0xff]  }
  0xbe   :  { %1387 = vmatpush1.bf16.msra.mxu0 %v5871_v63  ;;  %1559 = vmatpush1.bf16.msra.mxu1 %v5874_v0  ;;  %v5963_v63 = vld [vmem:[#allocation2 + $0x584] ss:$16 sps:$4 sm:$0xff]   ;;  %v5966_v0 = vld [vmem:[#allocation2 + $0x58c] ss:$16 sps:$4 sm:$0xff]  }
  0xbf   :  { %1388 = vmatprep.subr.bf16.mxu0 %v5879_v1  ;;  %1560 = vmatprep.subr.bf16.mxu1 %v5882_v2  ;;  %v5961_v1 = vld [vmem:[#allocation2 + $0x580] ss:$16 sps:$4 sm:$0xff]   ;;  %v5964_v2 = vld [vmem:[#allocation2 + $0x588] ss:$16 sps:$4 sm:$0xff]  }
  0xc2   :  { %1389 = vmatpush1.bf16.msra.mxu0 %v5877_v3  ;;  %1561 = vmatpush1.bf16.msra.mxu1 %v5880_v4  ;;  %v5969_v3 = vld [vmem:[#allocation2 + $0x5a4] ss:$16 sps:$4 sm:$0xff]   ;;  %v5972_v4 = vld [vmem:[#allocation2 + $0x5ac] ss:$16 sps:$4 sm:$0xff]  }
  0xc3   :  { %1390 = vmatprep.subr.bf16.mxu0 %v5885_v5  ;;  %1562 = vmatprep.subr.bf16.mxu1 %v5888_v6  ;;  %v5967_v5 = vld [vmem:[#allocation2 + $0x5a0] ss:$16 sps:$4 sm:$0xff]   ;;  %v5970_v6 = vld [vmem:[#allocation2 + $0x5a8] ss:$16 sps:$4 sm:$0xff]  }
  0xc6   :  { %1391 = vmatpush1.bf16.msra.mxu0 %v5883_v7  ;;  %1563 = vmatpush1.bf16.msra.mxu1 %v5886_v8  ;;  %v5975_v7 = vld [vmem:[#allocation2 + $0x5c4] ss:$16 sps:$4 sm:$0xff]   ;;  %v5978_v8 = vld [vmem:[#allocation2 + $0x5cc] ss:$16 sps:$4 sm:$0xff]  }
  0xc7   :  { %1403 = vmatprep.subr.bf16.mxu0 %v5891_v9  ;;  %1575 = vmatprep.subr.bf16.mxu1 %v5894_v12  ;;  %v5973_v9 = vld [vmem:[#allocation2 + $0x5c0] ss:$16 sps:$4 sm:$0xff]   ;;  %v5984_v12 = vld [vmem:[#allocation2 + $0x5ec] ss:$16 sps:$4 sm:$0xff]  }
  0xc9   :  { %1393 = vmatmul.mubr.bf16.vlgmr.msra.gmra.mrb[0].mxu0 %v110_v15  ;;  %1565 = vmatmul.mubr.bf16.vlgmr.msra.gmra.mrb[0].mxu1 %v110_v15  ;;  %v98_v15 = vld [vmem:[%s7029_s0 + $0x20] sm:$0xff] }
  0xca   :  { %1404 = vmatpush1.bf16.msra.mxu0 %v5889_v13  ;;  %1576 = vmatpush1.bf16.msra.mxu1 %v5892_v14  ;;  %v5979_v13 = vld [vmem:[#allocation2 + $0x5e0] ss:$16 sps:$4 sm:$0xff]   ;;  %v5982_v14 = vld [vmem:[#allocation2 + $0x5e8] ss:$16 sps:$4 sm:$0xff]  }
  0xcb   :  { %1405 = vmatprep.subr.bf16.mxu0 %v5897_v16  ;;  %1577 = vmatprep.subr.bf16.mxu1 %v5900_v17  ;;  %v105_v16 = vld [vmem:[%s7029_s0 + $0x58] sm:$0xff]  ;;  %v5987_v17 = vld [vmem:[#allocation2 + $0x604] ss:$16 sps:$4 sm:$0xff]  }
  0xcc   :  { %1435 = vmatprep.mubr.bf16.mxu0 %v113_v23  ;;  %1607 = vmatprep.mubr.bf16.mxu1 %v113_v23  ;;  %v112_v21 = vpack.c.bf16 %v105_v16, %v98_v15  ;;  %v5996_v23 = vld [vmem:[#allocation4 + $0xc] ss:$16 sps:$4 sm:$0xff]   ;;  %v6069_v16 = vld [vmem:[#allocation4 + $0x1a0] ss:$16 sps:$4 sm:$0xff]  }
  0xcd   :  { %v6074_v15 = vld [vmem:[#allocation4 + $0x1ac] ss:$16 sps:$4 sm:$0xff]  }
  0xce   :  { %1406 = vmatpush1.bf16.msra.mxu0 %v5895_v19  ;;  %1578 = vmatpush1.bf16.msra.mxu1 %v5898_v20  ;;  %v5985_v19 = vld [vmem:[#allocation2 + $0x600] ss:$16 sps:$4 sm:$0xff]   ;;  %v5988_v20 = vld [vmem:[#allocation2 + $0x608] ss:$16 sps:$4 sm:$0xff]  }
  0xcf   :  { %1407 = vmatprep.subr.bf16.mxu0 %v5903_v22  ;;  %1579 = vmatprep.subr.bf16.mxu1 %v5906_v24  ;;  %v5993_v22 = vld [vmem:[#allocation4 + $0x4] ss:$16 sps:$4 sm:$0xff]   ;;  %v6699_v24 = vmov 0  }
  0xd2   :  { %1408 = vmatpush1.bf16.msra.mxu0 %v5901_v25  ;;  %1580 = vmatpush1.bf16.msra.mxu1 %v5904_v26  ;;  %v100_v25 = vld [vmem:[%s7029_s0 + $0x30] sm:$0xff]  ;;  %v107_v26 = vld [vmem:[%s7029_s0 + $0x68] sm:$0xff] }
  0xd3   :  { %1409 = vmatprep.subr.bf16.mxu0 %v5909_v27  ;;  %1581 = vmatprep.subr.bf16.mxu1 %v5912_v28  ;;  %v5991_v27 = vld [vmem:[#allocation4] ss:$16 sps:$4 sm:$0xff]   ;;  %v5994_v28 = vld [vmem:[#allocation4 + $0x8] ss:$16 sps:$4 sm:$0xff]  }
  0xd6   :  { %1410 = vmatpush1.bf16.msra.mxu0 %v5907_v29  ;;  %1582 = vmatpush1.bf16.msra.mxu1 %v5910_v30  ;;  %v114_v29 = vpack.c.bf16 %v107_v26, %v100_v25  ;;  %v5999_v30 = vld [vmem:[#allocation4 + $0x24] ss:$16 sps:$4 sm:$0xff]   ;;  %v6084_v25 = vld [vmem:[#allocation4 + $0x1e8] ss:$16 sps:$4 sm:$0xff]  }
  0xd7   :  { %1411 = vmatprep.subr.bf16.mxu0 %v5915_v31  ;;  %1583 = vmatprep.subr.bf16.mxu1 %v5918_v32  ;;  %v6002_v31 = vld [vmem:[#allocation4 + $0x2c] ss:$16 sps:$4 sm:$0xff]   ;;  %v5997_v32 = vld [vmem:[#allocation4 + $0x20] ss:$16 sps:$4 sm:$0xff]   ;;  %v6089_v26 = vld [vmem:[#allocation4 + $0x204] ss:$16 sps:$4 sm:$0xff]  }
  0xda   :  { %1412 = vmatpush1.bf16.msra.mxu0 %v5913_v33  ;;  %1584 = vmatpush1.bf16.msra.mxu1 %v5916_v34  ;;  %v6000_v33 = vld [vmem:[#allocation4 + $0x28] ss:$16 sps:$4 sm:$0xff]   ;;  %v6005_v34 = vld [vmem:[#allocation4 + $0x44] ss:$16 sps:$4 sm:$0xff]  }
  0xdb   :  { %1413 = vmatprep.subr.bf16.mxu0 %v5921_v35  ;;  %1585 = vmatprep.subr.bf16.mxu1 %v5924_v36  ;;  %v6008_v35 = vld [vmem:[#allocation4 + $0x4c] ss:$16 sps:$4 sm:$0xff]   ;;  %v6003_v36 = vld [vmem:[#allocation4 + $0x40] ss:$16 sps:$4 sm:$0xff]  }
  0xde   :  { %1414 = vmatpush1.bf16.msra.mxu0 %v5919_v37  ;;  %1586 = vmatpush1.bf16.msra.mxu1 %v5922_v38  ;;  %v6006_v37 = vld [vmem:[#allocation4 + $0x48] ss:$16 sps:$4 sm:$0xff]   ;;  %v6011_v38 = vld [vmem:[#allocation4 + $0x64] ss:$16 sps:$4 sm:$0xff]  }
  0xdf   :  { %1415 = vmatprep.subr.bf16.mxu0 %v5927_v39  ;;  %1587 = vmatprep.subr.bf16.mxu1 %v5930_v40  ;;  %v6014_v39 = vld [vmem:[#allocation4 + $0x6c] ss:$16 sps:$4 sm:$0xff]   ;;  %v6009_v40 = vld [vmem:[#allocation4 + $0x60] ss:$16 sps:$4 sm:$0xff]  }
  0xe2   :  { %1416 = vmatpush1.bf16.msra.mxu0 %v5925_v41  ;;  %1588 = vmatpush1.bf16.msra.mxu1 %v5928_v42  ;;  %v6012_v41 = vld [vmem:[#allocation4 + $0x68] ss:$16 sps:$4 sm:$0xff]   ;;  %v6017_v42 = vld [vmem:[#allocation4 + $0x84] ss:$16 sps:$4 sm:$0xff]  }
  0xe3   :  { %1417 = vmatprep.subr.bf16.mxu0 %v5933_v43  ;;  %1589 = vmatprep.subr.bf16.mxu1 %v5936_v44  ;;  %v6020_v43 = vld [vmem:[#allocation4 + $0x8c] ss:$16 sps:$4 sm:$0xff]   ;;  %v6015_v44 = vld [vmem:[#allocation4 + $0x80] ss:$16 sps:$4 sm:$0xff]  }
  0xe6   :  { %1418 = vmatpush1.bf16.msra.mxu0 %v5931_v45  ;;  %1590 = vmatpush1.bf16.msra.mxu1 %v5934_v46  ;;  %v6018_v45 = vld [vmem:[#allocation4 + $0x88] ss:$16 sps:$4 sm:$0xff]   ;;  %v6023_v46 = vld [vmem:[#allocation4 + $0xa4] ss:$16 sps:$4 sm:$0xff]  }
  0xe7   :  { %1419 = vmatprep.subr.bf16.mxu0 %v5939_v47  ;;  %1591 = vmatprep.subr.bf16.mxu1 %v5942_v48  ;;  %v6026_v47 = vld [vmem:[#allocation4 + $0xac] ss:$16 sps:$4 sm:$0xff]   ;;  %v6021_v48 = vld [vmem:[#allocation4 + $0xa0] ss:$16 sps:$4 sm:$0xff]  }
  0xea   :  { %1420 = vmatpush1.bf16.msra.mxu0 %v5937_v49  ;;  %1592 = vmatpush1.bf16.msra.mxu1 %v5940_v50  ;;  %v6024_v49 = vld [vmem:[#allocation4 + $0xa8] ss:$16 sps:$4 sm:$0xff]   ;;  %v6029_v50 = vld [vmem:[#allocation4 + $0xc4] ss:$16 sps:$4 sm:$0xff]  }
  0xeb   :  { %1421 = vmatprep.subr.bf16.mxu0 %v5945_v51  ;;  %1593 = vmatprep.subr.bf16.mxu1 %v5948_v52  ;;  %v6032_v51 = vld [vmem:[#allocation4 + $0xcc] ss:$16 sps:$4 sm:$0xff]   ;;  %v6027_v52 = vld [vmem:[#allocation4 + $0xc0] ss:$16 sps:$4 sm:$0xff]  }
  0xee   :  { %1422 = vmatpush1.bf16.msra.mxu0 %v5943_v53  ;;  %1594 = vmatpush1.bf16.msra.mxu1 %v5946_v54  ;;  %v6030_v53 = vld [vmem:[#allocation4 + $0xc8] ss:$16 sps:$4 sm:$0xff]   ;;  %v6035_v54 = vld [vmem:[#allocation4 + $0xe4] ss:$16 sps:$4 sm:$0xff]  }
  0xef   :  { %1423 = vmatprep.subr.bf16.mxu0 %v5951_v55  ;;  %1595 = vmatprep.subr.bf16.mxu1 %v5954_v56  ;;  %v6038_v55 = vld [vmem:[#allocation4 + $0xec] ss:$16 sps:$4 sm:$0xff]   ;;  %v6033_v56 = vld [vmem:[#allocation4 + $0xe0] ss:$16 sps:$4 sm:$0xff]  }
  0xf2   :  { %1424 = vmatpush1.bf16.msra.mxu0 %v5949_v57  ;;  %1596 = vmatpush1.bf16.msra.mxu1 %v5952_v58  ;;  %v6036_v57 = vld [vmem:[#allocation4 + $0xe8] ss:$16 sps:$4 sm:$0xff]   ;;  %v6041_v58 = vld [vmem:[#allocation4 + $0x104] ss:$16 sps:$4 sm:$0xff]  }
  0xf3   :  { %1425 = vmatprep.subr.bf16.mxu0 %v5957_v59  ;;  %1597 = vmatprep.subr.bf16.mxu1 %v5960_v60  ;;  %v6044_v59 = vld [vmem:[#allocation4 + $0x10c] ss:$16 sps:$4 sm:$0xff]   ;;  %v6039_v60 = vld [vmem:[#allocation4 + $0x100] ss:$16 sps:$4 sm:$0xff]  }
  0xf6   :  { %1426 = vmatpush1.bf16.msra.mxu0 %v5955_v61  ;;  %1598 = vmatpush1.bf16.msra.mxu1 %v5958_v62  ;;  %v6042_v61 = vld [vmem:[#allocation4 + $0x108] ss:$16 sps:$4 sm:$0xff]   ;;  %v6047_v62 = vld [vmem:[#allocation4 + $0x124] ss:$16 sps:$4 sm:$0xff]  }
  0xf7   :  { %1427 = vmatprep.subr.bf16.mxu0 %v5963_v63  ;;  %1599 = vmatprep.subr.bf16.mxu1 %v5966_v0  ;;  %v6050_v63 = vld [vmem:[#allocation4 + $0x12c] ss:$16 sps:$4 sm:$0xff]   ;;  %v6045_v0 = vld [vmem:[#allocation4 + $0x120] ss:$16 sps:$4 sm:$0xff]  }
  0xfa   :  { %1428 = vmatpush1.bf16.msra.mxu0 %v5961_v1  ;;  %1600 = vmatpush1.bf16.msra.mxu1 %v5964_v2  ;;  %v6048_v1 = vld [vmem:[#allocation4 + $0x128] ss:$16 sps:$4 sm:$0xff]   ;;  %v6053_v2 = vld [vmem:[#allocation4 + $0x144] ss:$16 sps:$4 sm:$0xff]  }
  0xfb   :  { %1429 = vmatprep.subr.bf16.mxu0 %v5969_v3  ;;  %1601 = vmatprep.subr.bf16.mxu1 %v5972_v4  ;;  %v6056_v3 = vld [vmem:[#allocation4 + $0x14c] ss:$16 sps:$4 sm:$0xff]   ;;  %v6051_v4 = vld [vmem:[#allocation4 + $0x140] ss:$16 sps:$4 sm:$0xff]  }
  0xfe   :  { %1430 = vmatpush1.bf16.msra.mxu0 %v5967_v5  ;;  %1602 = vmatpush1.bf16.msra.mxu1 %v5970_v6  ;;  %v6054_v5 = vld [vmem:[#allocation4 + $0x148] ss:$16 sps:$4 sm:$0xff]   ;;  %v6059_v6 = vld [vmem:[#allocation4 + $0x164] ss:$16 sps:$4 sm:$0xff]  }
  0xff   :  { %1431 = vmatprep.subr.bf16.mxu0 %v5975_v7  ;;  %1603 = vmatprep.subr.bf16.mxu1 %v5978_v8  ;;  %v6062_v7 = vld [vmem:[#allocation4 + $0x16c] ss:$16 sps:$4 sm:$0xff]   ;;  %v6057_v8 = vld [vmem:[#allocation4 + $0x160] ss:$16 sps:$4 sm:$0xff]  }
 0x102   :  { %1432 = vmatpush1.bf16.msra.mxu0 %v5973_v9  ;;  %1604 = vmatpush1.bf16.msra.mxu1 %v5976_v10  ;;  %v6060_v9 = vld [vmem:[#allocation4 + $0x168] ss:$16 sps:$4 sm:$0xff]   ;;  %v6065_v10 = vld [vmem:[#allocation4 + $0x184] ss:$16 sps:$4 sm:$0xff]  }
 0x103   :  { %1433 = vmatprep.subr.bf16.mxu0 %v5981_v11  ;;  %1605 = vmatprep.subr.bf16.mxu1 %v5984_v12  ;;  %v6068_v11 = vld [vmem:[#allocation4 + $0x18c] ss:$16 sps:$4 sm:$0xff]   ;;  %v6063_v12 = vld [vmem:[#allocation4 + $0x180] ss:$16 sps:$4 sm:$0xff]  }
 0x106   :  { %1434 = vmatpush1.bf16.msra.mxu0 %v5979_v13  ;;  %1606 = vmatpush1.bf16.msra.mxu1 %v5982_v14  ;;  %v6066_v13 = vld [vmem:[#allocation4 + $0x188] ss:$16 sps:$4 sm:$0xff]   ;;  %v6071_v14 = vld [vmem:[#allocation4 + $0x1a4] ss:$16 sps:$4 sm:$0xff]  }
 0x107   :  { %1446 = vmatprep.subr.bf16.mxu0 %v5987_v17  ;;  %1618 = vmatprep.subr.bf16.mxu1 %v5990_v18  ;;  %v6072_v17 = vld [vmem:[#allocation4 + $0x1a8] ss:$16 sps:$4 sm:$0xff]   ;;  %v6077_v18 = vld [vmem:[#allocation4 + $0x1c4] ss:$16 sps:$4 sm:$0xff]  }
 0x109   :  { %1436 = vmatmul.mubr.bf16.vlgmr.msra.gmra.mrb[0].mxu0 %v112_v21  ;;  %1608 = vmatmul.mubr.bf16.vlgmr.msra.gmra.mrb[0].mxu1 %v112_v21  ;;  %v6078_v21 = vld [vmem:[#allocation4 + $0x1c8] ss:$16 sps:$4 sm:$0xff]  }
 0x10a   :  { %1447 = vmatpush1.bf16.msra.mxu0 %v5985_v19  ;;  %1619 = vmatpush1.bf16.msra.mxu1 %v5988_v20  ;;  %v6080_v19 = vld [vmem:[#allocation4 + $0x1cc] ss:$16 sps:$4 sm:$0xff]   ;;  %v6075_v20 = vld [vmem:[#allocation4 + $0x1c0] ss:$16 sps:$4 sm:$0xff]  }
 0x10b   :  { %1478 = vmatprep.mubr.bf16.mxu0 %v6699_v24  ;;  %1650 = vmatprep.mubr.bf16.mxu1 %v6699_v24  ;;  %v6081_v24 = vld [vmem:[#allocation4 + $0x1e0] ss:$16 sps:$4 sm:$0xff]  }
 0x10c   :  { %2463 = vmatprep.subr.bf16.mxu0 %v5993_v22  ;;  %2549 = vmatprep.subr.bf16.mxu1 %v5996_v23  ;;  %v6083_v22 = vld [vmem:[#allocation4 + $0x1e4] ss:$16 sps:$4 sm:$0xff]   ;;  %v6086_v23 = vld [vmem:[#allocation4 + $0x1ec] ss:$16 sps:$4 sm:$0xff]  }
 0x115   :  { %5147 = vmatmul.mubr.msk.bf16.vlgmr.msra.gmra.mrb[0].mxu0 %vm1313_vm0, %v114_v29  ;;  %5148 = vmatmul.mubr.msk.bf16.vlgmr.msra.gmra.mrb[0].mxu1 %vm1313_vm0, %v114_v29 }
 0x116   :  { %2464 = vmatpush1.bf16.msra.mxu0 %v5991_v27  ;;  %2550 = vmatpush1.bf16.msra.mxu1 %v5994_v28  ;;  %v6092_v27 = vld [vmem:[#allocation4 + $0x20c] ss:$16 sps:$4 sm:$0xff]   ;;  %v313_v28 = vlaneseq }
 0x117   :  { %2465 = vmatprep.subr.bf16.mxu0 %v5999_v30  ;;  %2551 = vmatprep.subr.bf16.mxu1 %v6002_v31 }
 0x118   :  { %v314_v29 = vshrl.u32 %v313_v28, 7  ;;  %v6126_v28 = vld [vmem:[#allocation4 + $0x2c8] ss:$16 sps:$4 sm:$0xff]  }
 0x11a   :  { %2466 = vmatpush1.bf16.msra.mxu0 %v5997_v32  ;;  %2552 = vmatpush1.bf16.msra.mxu1 %v6000_v33  ;;  %v6876_v30 = vsub.s32 0, %v314_v29  ;;  %v6878_v31 = vsub.s32 2, %v314_v29  ;;  %v311_v32 = vld [vmem:[%s7031_s2] sm:$0xf]  ;;  %v6883_v33 = vsub.s32 1, %v314_v29 }
 0x11b   :  { %2467 = vmatprep.subr.bf16.mxu0 %v6005_v34  ;;  %2553 = vmatprep.subr.bf16.mxu1 %v6008_v35  ;;  %v6885_v34 = vsub.s32 3, %v314_v29  ;;  %v6131_v29 = vld [vmem:[#allocation4 + $0x2e4] ss:$16 sps:$4 sm:$0xff]  }
 0x11c   :  { %v316_v35 = vrot.slane %v311_v32, %v6876_v30 }
 0x11e   :  { %2468 = vmatpush1.bf16.msra.mxu0 %v6003_v36  ;;  %2554 = vmatpush1.bf16.msra.mxu1 %v6006_v37  ;;  %v324_v36 = vrot.slane %v311_v32, %v6878_v31  ;;  %v320_v37 = vrot.slane %v311_v32, %v6883_v33 }
 0x11f   :  { %2469 = vmatprep.subr.bf16.mxu0 %v6011_v38  ;;  %2555 = vmatprep.subr.bf16.mxu1 %v6014_v39  ;;  %v328_v38 = vrot.slane %v311_v32, %v6885_v34  ;;  %v6134_v32 = vld [vmem:[#allocation4 + $0x2ec] ss:$16 sps:$4 sm:$0xff]  }
 0x122   :  { %2470 = vmatpush1.bf16.msra.mxu0 %v6009_v40  ;;  %2556 = vmatpush1.bf16.msra.mxu1 %v6012_v41 }
 0x123   :  { %2471 = vmatprep.subr.bf16.mxu0 %v6017_v42  ;;  %2557 = vmatprep.subr.bf16.mxu1 %v6020_v43 }
 0x126   :  { %2472 = vmatpush1.bf16.msra.mxu0 %v6015_v44  ;;  %2558 = vmatpush1.bf16.msra.mxu1 %v6018_v45 }
 0x127   :  { %2473 = vmatprep.subr.bf16.mxu0 %v6023_v46  ;;  %2559 = vmatprep.subr.bf16.mxu1 %v6026_v47 }
 0x12a   :  { %2474 = vmatpush1.bf16.msra.mxu0 %v6021_v48  ;;  %2560 = vmatpush1.bf16.msra.mxu1 %v6024_v49 }
 0x12b   :  { %2475 = vmatprep.subr.bf16.mxu0 %v6029_v50  ;;  %2561 = vmatprep.subr.bf16.mxu1 %v6032_v51 }
 0x12e   :  { %2476 = vmatpush1.bf16.msra.mxu0 %v6027_v52  ;;  %2562 = vmatpush1.bf16.msra.mxu1 %v6030_v53 }
 0x12f   :  { %2477 = vmatprep.subr.bf16.mxu0 %v6035_v54  ;;  %2563 = vmatprep.subr.bf16.mxu1 %v6038_v55 }
 0x132   :  { %2478 = vmatpush1.bf16.msra.mxu0 %v6033_v56  ;;  %2564 = vmatpush1.bf16.msra.mxu1 %v6036_v57 }
 0x133   :  { %2479 = vmatprep.subr.bf16.mxu0 %v6041_v58  ;;  %2565 = vmatprep.subr.bf16.mxu1 %v6044_v59 }
 0x136   :  { %2480 = vmatpush1.bf16.msra.mxu0 %v6039_v60  ;;  %2566 = vmatpush1.bf16.msra.mxu1 %v6042_v61 }
 0x137   :  { %2481 = vmatprep.subr.bf16.mxu0 %v6047_v62  ;;  %2567 = vmatprep.subr.bf16.mxu1 %v6050_v63 }
 0x13a   :  { %2482 = vmatpush1.bf16.msra.mxu0 %v6045_v0  ;;  %2568 = vmatpush1.bf16.msra.mxu1 %v6048_v1 }
 0x13b   :  { %2483 = vmatprep.subr.bf16.mxu0 %v6053_v2  ;;  %2569 = vmatprep.subr.bf16.mxu1 %v6056_v3  ;;  %v6087_v3 = vld [vmem:[#allocation4 + $0x200] ss:$16 sps:$4 sm:$0xff]  }
 0x13e   :  { %2484 = vmatpush1.bf16.msra.mxu0 %v6051_v4  ;;  %2570 = vmatpush1.bf16.msra.mxu1 %v6054_v5  ;;  %v6090_v4 = vld [vmem:[#allocation4 + $0x208] ss:$16 sps:$4 sm:$0xff]   ;;  %v6095_v5 = vld [vmem:[#allocation4 + $0x224] ss:$16 sps:$4 sm:$0xff]  }
 0x13f   :  { %2485 = vmatprep.subr.bf16.mxu0 %v6059_v6  ;;  %2571 = vmatprep.subr.bf16.mxu1 %v6062_v7  ;;  %v6098_v6 = vld [vmem:[#allocation4 + $0x22c] ss:$16 sps:$4 sm:$0xff]   ;;  %v6093_v7 = vld [vmem:[#allocation4 + $0x220] ss:$16 sps:$4 sm:$0xff]  }
 0x142   :  { %2486 = vmatpush1.bf16.msra.mxu0 %v6057_v8  ;;  %2572 = vmatpush1.bf16.msra.mxu1 %v6060_v9  ;;  %v6096_v8 = vld [vmem:[#allocation4 + $0x228] ss:$16 sps:$4 sm:$0xff]   ;;  %v6101_v9 = vld [vmem:[#allocation4 + $0x244] ss:$16 sps:$4 sm:$0xff]  }
 0x143   :  { %2487 = vmatprep.subr.bf16.mxu0 %v6065_v10  ;;  %2573 = vmatprep.subr.bf16.mxu1 %v6068_v11  ;;  %v6104_v10 = vld [vmem:[#allocation4 + $0x24c] ss:$16 sps:$4 sm:$0xff]   ;;  %v6099_v11 = vld [vmem:[#allocation4 + $0x240] ss:$16 sps:$4 sm:$0xff]  }
 0x146   :  { %2488 = vmatpush1.bf16.msra.mxu0 %v6063_v12  ;;  %2574 = vmatpush1.bf16.msra.mxu1 %v6066_v13  ;;  %v6102_v12 = vld [vmem:[#allocation4 + $0x248] ss:$16 sps:$4 sm:$0xff]   ;;  %v6107_v13 = vld [vmem:[#allocation4 + $0x264] ss:$16 sps:$4 sm:$0xff]  }
 0x147   :  { %2489 = vmatprep.subr.bf16.mxu0 %v6071_v14  ;;  %2575 = vmatprep.subr.bf16.mxu1 %v6074_v15  ;;  %v6110_v14 = vld [vmem:[#allocation4 + $0x26c] ss:$16 sps:$4 sm:$0xff]   ;;  %v6105_v15 = vld [vmem:[#allocation4 + $0x260] ss:$16 sps:$4 sm:$0xff]  }
 0x14a   :  { %2490 = vmatpush1.bf16.msra.mxu0 %v6069_v16  ;;  %2576 = vmatpush1.bf16.msra.mxu1 %v6072_v17  ;;  %v6108_v16 = vld [vmem:[#allocation4 + $0x268] ss:$16 sps:$4 sm:$0xff]   ;;  %v6113_v17 = vld [vmem:[#allocation4 + $0x284] ss:$16 sps:$4 sm:$0xff]  }
 0x14b   :  { %2491 = vmatprep.subr.bf16.mxu0 %v6077_v18  ;;  %2577 = vmatprep.subr.bf16.mxu1 %v6080_v19  ;;  %v6116_v18 = vld [vmem:[#allocation4 + $0x28c] ss:$16 sps:$4 sm:$0xff]   ;;  %v6111_v19 = vld [vmem:[#allocation4 + $0x280] ss:$16 sps:$4 sm:$0xff]  }
 0x14e   :  { %2492 = vmatpush1.bf16.msra.mxu0 %v6075_v20  ;;  %2578 = vmatpush1.bf16.msra.mxu1 %v6078_v21  ;;  %v6114_v20 = vld [vmem:[#allocation4 + $0x288] ss:$16 sps:$4 sm:$0xff]   ;;  %v6119_v21 = vld [vmem:[#allocation4 + $0x2a4] ss:$16 sps:$4 sm:$0xff]  }
 0x14f   :  { %2493 = vmatprep.subr.bf16.mxu0 %v6083_v22  ;;  %2579 = vmatprep.subr.bf16.mxu1 %v6086_v23  ;;  %v6122_v22 = vld [vmem:[#allocation4 + $0x2ac] ss:$16 sps:$4 sm:$0xff]   ;;  %v6117_v23 = vld [vmem:[#allocation4 + $0x2a0] ss:$16 sps:$4 sm:$0xff]  }
 0x152   :  { %2494 = vmatpush1.bf16.msra.mxu0 %v6081_v24  ;;  %2580 = vmatpush1.bf16.msra.mxu1 %v6084_v25  ;;  %v6120_v24 = vld [vmem:[#allocation4 + $0x2a8] ss:$16 sps:$4 sm:$0xff]   ;;  %v6125_v25 = vld [vmem:[#allocation4 + $0x2c4] ss:$16 sps:$4 sm:$0xff]  }
 0x153   :  { %2506 = vmatprep.subr.bf16.mxu0 %v6089_v26  ;;  %2592 = vmatprep.subr.bf16.mxu1 %v6092_v27  ;;  %v6128_v26 = vld [vmem:[#allocation4 + $0x2cc] ss:$16 sps:$4 sm:$0xff]   ;;  %v6123_v27 = vld [vmem:[#allocation4 + $0x2c0] ss:$16 sps:$4 sm:$0xff]  }
 0x1e8   :  { %v1480_v39 = vpop.f32.mrb[0].mxu0  ;;  %v1652_v40 = vpop.f32.mrb[0].mxu1 }
 0x1e9   :  { %v5610_v41 = vadd.f32 %v1480_v39, %v316_v35  ;;  %v5614_v42 = vadd.f32 %v1652_v40, %v324_v36  ;;  %v1482_v43 = vpop.f32.mrb[1].mxu0  ;;  %v1654_v44 = vpop.f32.mrb[1].mxu1  ;;  %v6135_v39 = vld [vmem:[#allocation4 + $0x300] ss:$16 sps:$4 sm:$0xff]   ;;  %v6138_v40 = vld [vmem:[#allocation4 + $0x308] ss:$16 sps:$4 sm:$0xff]  }
 0x1ea   :  { %v5611_v45 = vadd.f32 %v1482_v43, %v320_v37  ;;  %v5615_v46 = vadd.f32 %v1654_v44, %v328_v38  ;;  %v1484_v47 = vpop.f32.mrb[2].mxu0  ;;  %v1656_v48 = vpop.f32.mrb[2].mxu1  ;;  %v6141_v43 = vld [vmem:[#allocation4 + $0x320] ss:$16 sps:$4 sm:$0xff]   ;;  %v6144_v44 = vld [vmem:[#allocation4 + $0x328] ss:$16 sps:$4 sm:$0xff]  }
 0x1eb   :  { %v5612_v49 = vadd.f32 %v1484_v47, %v316_v35  ;;  %v5616_v50 = vadd.f32 %v1656_v48, %v324_v36  ;;  %v1486_v51 = vpop.f32.mrb[3].mxu0  ;;  %v1658_v52 = vpop.f32.mrb[3].mxu1  ;;  %v1661_v55 = vmax.f32 %v5610_v41, 0.0  ;;  %v1663_v56 = vmax.f32 %v5614_v42, 0.0  ;;  %v6129_v35 = vld [vmem:[#allocation4 + $0x2e0] ss:$16 sps:$4 sm:$0xff]  }
 0x1ec   :  { %v5613_v53 = vadd.f32 %v1486_v51, %v320_v37  ;;  %v5617_v54 = vadd.f32 %v1658_v52, %v328_v38  ;;  %v1662_v59 = vmax.f32 %v5611_v45, 0.0  ;;  %v1664_v60 = vmax.f32 %v5615_v46, 0.0  ;;  %v6132_v36 = vld [vmem:[#allocation4 + $0x2e8] ss:$16 sps:$4 sm:$0xff]   ;;  %v6137_v37 = vld [vmem:[#allocation4 + $0x304] ss:$16 sps:$4 sm:$0xff]  }
 0x1ed   :  { %v1665_v57 = vmax.f32 %v5612_v49, 0.0  ;;  %v1667_v58 = vmax.f32 %v5616_v50, 0.0  ;;  %v6140_v38 = vld [vmem:[#allocation4 + $0x30c] ss:$16 sps:$4 sm:$0xff]   ;;  %v6143_v41 = vld [vmem:[#allocation4 + $0x324] ss:$16 sps:$4 sm:$0xff]  }
 0x1ee   :  { %v1666_v61 = vmax.f32 %v5613_v53, 0.0  ;;  %v1668_v62 = vmax.f32 %v5617_v54, 0.0  ;;  %v6146_v42 = vld [vmem:[#allocation4 + $0x32c] ss:$16 sps:$4 sm:$0xff]   ;;  %v6149_v45 = vld [vmem:[#allocation4 + $0x344] ss:$16 sps:$4 sm:$0xff]  }
 0x1ef   :  { %v1669_v63 = vpack.c.bf16 %v1665_v57, %v1661_v55  ;;  %v6891_v0 = vpack.c.bf16 %v1667_v58, %v1663_v56  ;;  %v6152_v46 = vld [vmem:[#allocation4 + $0x34c] ss:$16 sps:$4 sm:$0xff]   ;;  %v6147_v47 = vld [vmem:[#allocation4 + $0x340] ss:$16 sps:$4 sm:$0xff]   ;;  %v6150_v48 = vld [vmem:[#allocation4 + $0x348] ss:$16 sps:$4 sm:$0xff]  }
 0x1f0   :  { %v1670_v1 = vpack.c.bf16 %v1666_v61, %v1662_v59  ;;  %v1672_v2 = vpack.c.bf16 %v1668_v62, %v1664_v60  ;;  %v6155_v49 = vld [vmem:[#allocation4 + $0x364] ss:$16 sps:$4 sm:$0xff]   ;;  %v6158_v50 = vld [vmem:[#allocation4 + $0x36c] ss:$16 sps:$4 sm:$0xff]   ;;  %v6153_v51 = vld [vmem:[#allocation4 + $0x360] ss:$16 sps:$4 sm:$0xff]  }
 0x1f1   :  { %v6156_v52 = vld [vmem:[#allocation4 + $0x368] ss:$16 sps:$4 sm:$0xff]   ;;  %v6161_v53 = vld [vmem:[#allocation4 + $0x384] ss:$16 sps:$4 sm:$0xff]   ;;  %v6164_v54 = vld [vmem:[#allocation4 + $0x38c] ss:$16 sps:$4 sm:$0xff]  }
 0x1f2   :  { %2495 = vmatprep.mubr.bf16.mxu0 %v1670_v1  ;;  %2581 = vmatprep.mubr.bf16.mxu1 %v1670_v1  ;;  %v6159_v55 = vld [vmem:[#allocation4 + $0x380] ss:$16 sps:$4 sm:$0xff]   ;;  %v6162_v56 = vld [vmem:[#allocation4 + $0x388] ss:$16 sps:$4 sm:$0xff]   ;;  %v6167_v57 = vld [vmem:[#allocation4 + $0x3a4] ss:$16 sps:$4 sm:$0xff]  }
 0x1f3   :  { %2496 = vmatmul.mubr.bf16.vlgmr.msra.gmra.mrb[4].mxu0 %v1669_v63  ;;  %2582 = vmatmul.mubr.bf16.vlgmr.msra.gmra.mrb[4].mxu1 %v1669_v63  ;;  %v6170_v58 = vld [vmem:[#allocation4 + $0x3ac] ss:$16 sps:$4 sm:$0xff]   ;;  %v6165_v59 = vld [vmem:[#allocation4 + $0x3a0] ss:$16 sps:$4 sm:$0xff]   ;;  %v6168_v60 = vld [vmem:[#allocation4 + $0x3a8] ss:$16 sps:$4 sm:$0xff]  }
 0x1f4   :  { %2507 = vmatpush1.bf16.msra.mxu0 %v6087_v3  ;;  %2593 = vmatpush1.bf16.msra.mxu1 %v6090_v4  ;;  %v6173_v61 = vld [vmem:[#allocation4 + $0x3c4] ss:$16 sps:$4 sm:$0xff]   ;;  %v6176_v62 = vld [vmem:[#allocation4 + $0x3cc] ss:$16 sps:$4 sm:$0xff]   ;;  %v6171_v63 = vld [vmem:[#allocation4 + $0x3c0] ss:$16 sps:$4 sm:$0xff]  }
 0x1f5   :  { %2538 = vmatprep.mubr.bf16.mxu0 %v1672_v2  ;;  %2624 = vmatprep.mubr.bf16.mxu1 %v1672_v2  ;;  %v6174_v1 = vld [vmem:[#allocation4 + $0x3c8] ss:$16 sps:$4 sm:$0xff]   ;;  %v6179_v2 = vld [vmem:[#allocation4 + $0x3e4] ss:$16 sps:$4 sm:$0xff]   ;;  %v6182_v3 = vld [vmem:[#allocation4 + $0x3ec] ss:$16 sps:$4 sm:$0xff]  }
 0x1f6   :  { %2508 = vmatprep.subr.bf16.mxu0 %v6095_v5  ;;  %2594 = vmatprep.subr.bf16.mxu1 %v6098_v6  ;;  %v6177_v4 = vld [vmem:[#allocation4 + $0x3e0] ss:$16 sps:$4 sm:$0xff]   ;;  %v6180_v5 = vld [vmem:[#allocation4 + $0x3e8] ss:$16 sps:$4 sm:$0xff]   ;;  %v6185_v6 = vld [vmem:[#allocation6 + $0x4] ss:$16 sps:$4 sm:$0xff]  }
 0x1f8   :  { %2509 = vmatpush1.bf16.msra.mxu0 %v6093_v7  ;;  %2595 = vmatpush1.bf16.msra.mxu1 %v6096_v8  ;;  %v6188_v7 = vld [vmem:[#allocation6 + $0xc] ss:$16 sps:$4 sm:$0xff]   ;;  %v6183_v8 = vld [vmem:[#allocation6] ss:$16 sps:$4 sm:$0xff]  }
 0x1f9   :  { %2510 = vmatprep.subr.bf16.mxu0 %v6101_v9  ;;  %2596 = vmatprep.subr.bf16.mxu1 %v6104_v10  ;;  %v6186_v9 = vld [vmem:[#allocation6 + $0x8] ss:$16 sps:$4 sm:$0xff]   ;;  %v6191_v10 = vld [vmem:[#allocation6 + $0x24] ss:$16 sps:$4 sm:$0xff]  }
 0x1fc   :  { %2511 = vmatpush1.bf16.msra.mxu0 %v6099_v11  ;;  %2597 = vmatpush1.bf16.msra.mxu1 %v6102_v12  ;;  %v6194_v11 = vld [vmem:[#allocation6 + $0x2c] ss:$16 sps:$4 sm:$0xff]   ;;  %v6189_v12 = vld [vmem:[#allocation6 + $0x20] ss:$16 sps:$4 sm:$0xff]  }
 0x1fd   :  { %2512 = vmatprep.subr.bf16.mxu0 %v6107_v13  ;;  %2598 = vmatprep.subr.bf16.mxu1 %v6110_v14  ;;  %v6192_v13 = vld [vmem:[#allocation6 + $0x28] ss:$16 sps:$4 sm:$0xff]   ;;  %v6197_v14 = vld [vmem:[#allocation6 + $0x44] ss:$16 sps:$4 sm:$0xff]  }
 0x200   :  { %2513 = vmatpush1.bf16.msra.mxu0 %v6105_v15  ;;  %2599 = vmatpush1.bf16.msra.mxu1 %v6108_v16  ;;  %v6200_v15 = vld [vmem:[#allocation6 + $0x4c] ss:$16 sps:$4 sm:$0xff]   ;;  %v6195_v16 = vld [vmem:[#allocation6 + $0x40] ss:$16 sps:$4 sm:$0xff]  }
 0x201   :  { %2514 = vmatprep.subr.bf16.mxu0 %v6113_v17  ;;  %2600 = vmatprep.subr.bf16.mxu1 %v6116_v18  ;;  %v6198_v17 = vld [vmem:[#allocation6 + $0x48] ss:$16 sps:$4 sm:$0xff]   ;;  %v6203_v18 = vld [vmem:[#allocation6 + $0x64] ss:$16 sps:$4 sm:$0xff]  }
 0x204   :  { %2515 = vmatpush1.bf16.msra.mxu0 %v6111_v19  ;;  %2601 = vmatpush1.bf16.msra.mxu1 %v6114_v20  ;;  %v6206_v19 = vld [vmem:[#allocation6 + $0x6c] ss:$16 sps:$4 sm:$0xff]   ;;  %v6201_v20 = vld [vmem:[#allocation6 + $0x60] ss:$16 sps:$4 sm:$0xff]  }
 0x205   :  { %2516 = vmatprep.subr.bf16.mxu0 %v6119_v21  ;;  %2602 = vmatprep.subr.bf16.mxu1 %v6122_v22  ;;  %v6209_v21 = vld [vmem:[#allocation6 + $0x84] ss:$16 sps:$4 sm:$0xff]   ;;  %v6212_v22 = vld [vmem:[#allocation6 + $0x8c] ss:$16 sps:$4 sm:$0xff]  }
 0x208   :  { %2517 = vmatpush1.bf16.msra.mxu0 %v6117_v23  ;;  %2603 = vmatpush1.bf16.msra.mxu1 %v6120_v24  ;;  %v6207_v23 = vld [vmem:[#allocation6 + $0x80] ss:$16 sps:$4 sm:$0xff]   ;;  %v6210_v24 = vld [vmem:[#allocation6 + $0x88] ss:$16 sps:$4 sm:$0xff]  }
 0x209   :  { %2518 = vmatprep.subr.bf16.mxu0 %v6125_v25  ;;  %2604 = vmatprep.subr.bf16.mxu1 %v6128_v26  ;;  %v6215_v25 = vld [vmem:[#allocation6 + $0xa4] ss:$16 sps:$4 sm:$0xff]   ;;  %v6218_v26 = vld [vmem:[#allocation6 + $0xac] ss:$16 sps:$4 sm:$0xff]  }
 0x20c   :  { %2519 = vmatpush1.bf16.msra.mxu0 %v6123_v27  ;;  %2605 = vmatpush1.bf16.msra.mxu1 %v6126_v28  ;;  %v6213_v27 = vld [vmem:[#allocation6 + $0xa0] ss:$16 sps:$4 sm:$0xff]   ;;  %v6216_v28 = vld [vmem:[#allocation6 + $0xa8] ss:$16 sps:$4 sm:$0xff]  }
 0x20d   :  { %2520 = vmatprep.subr.bf16.mxu0 %v6131_v29  ;;  %2606 = vmatprep.subr.bf16.mxu1 %v6134_v32  ;;  %v6221_v29 = vld [vmem:[#allocation6 + $0xc4] ss:$16 sps:$4 sm:$0xff]   ;;  %v6224_v32 = vld [vmem:[#allocation6 + $0xcc] ss:$16 sps:$4 sm:$0xff]  }
 0x210   :  { %2521 = vmatpush1.bf16.msra.mxu0 %v6129_v35  ;;  %2607 = vmatpush1.bf16.msra.mxu1 %v6132_v36  ;;  %v6219_v35 = vld [vmem:[#allocation6 + $0xc0] ss:$16 sps:$4 sm:$0xff]   ;;  %v6222_v36 = vld [vmem:[#allocation6 + $0xc8] ss:$16 sps:$4 sm:$0xff]  }
 0x211   :  { %2522 = vmatprep.subr.bf16.mxu0 %v6137_v37  ;;  %2608 = vmatprep.subr.bf16.mxu1 %v6140_v38  ;;  %v6227_v37 = vld [vmem:[#allocation6 + $0xe4] ss:$16 sps:$4 sm:$0xff]   ;;  %v6230_v38 = vld [vmem:[#allocation6 + $0xec] ss:$16 sps:$4 sm:$0xff]  }
 0x214   :  { %2523 = vmatpush1.bf16.msra.mxu0 %v6135_v39  ;;  %2609 = vmatpush1.bf16.msra.mxu1 %v6138_v40  ;;  %v6225_v39 = vld [vmem:[#allocation6 + $0xe0] ss:$16 sps:$4 sm:$0xff]   ;;  %v6228_v40 = vld [vmem:[#allocation6 + $0xe8] ss:$16 sps:$4 sm:$0xff]  }
 0x215   :  { %2524 = vmatprep.subr.bf16.mxu0 %v6143_v41  ;;  %2610 = vmatprep.subr.bf16.mxu1 %v6146_v42  ;;  %v6233_v41 = vld [vmem:[#allocation6 + $0x104] ss:$16 sps:$4 sm:$0xff]   ;;  %v6236_v42 = vld [vmem:[#allocation6 + $0x10c] ss:$16 sps:$4 sm:$0xff]  }
 0x218   :  { %2525 = vmatpush1.bf16.msra.mxu0 %v6141_v43  ;;  %2611 = vmatpush1.bf16.msra.mxu1 %v6144_v44  ;;  %v6231_v43 = vld [vmem:[#allocation6 + $0x100] ss:$16 sps:$4 sm:$0xff]   ;;  %v6234_v44 = vld [vmem:[#allocation6 + $0x108] ss:$16 sps:$4 sm:$0xff]  }
 0x219   :  { %2526 = vmatprep.subr.bf16.mxu0 %v6149_v45  ;;  %2612 = vmatprep.subr.bf16.mxu1 %v6152_v46  ;;  %v6239_v45 = vld [vmem:[#allocation6 + $0x124] ss:$16 sps:$4 sm:$0xff]   ;;  %v6242_v46 = vld [vmem:[#allocation6 + $0x12c] ss:$16 sps:$4 sm:$0xff]  }
 0x21c   :  { %2527 = vmatpush1.bf16.msra.mxu0 %v6147_v47  ;;  %2613 = vmatpush1.bf16.msra.mxu1 %v6150_v48  ;;  %v6237_v47 = vld [vmem:[#allocation6 + $0x120] ss:$16 sps:$4 sm:$0xff]   ;;  %v6240_v48 = vld [vmem:[#allocation6 + $0x128] ss:$16 sps:$4 sm:$0xff]  }
 0x21d   :  { %2528 = vmatprep.subr.bf16.mxu0 %v6155_v49  ;;  %2614 = vmatprep.subr.bf16.mxu1 %v6158_v50  ;;  %v6245_v49 = vld [vmem:[#allocation6 + $0x144] ss:$16 sps:$4 sm:$0xff]   ;;  %v6248_v50 = vld [vmem:[#allocation6 + $0x14c] ss:$16 sps:$4 sm:$0xff]  }
 0x220   :  { %2529 = vmatpush1.bf16.msra.mxu0 %v6153_v51  ;;  %2615 = vmatpush1.bf16.msra.mxu1 %v6156_v52  ;;  %v6243_v51 = vld [vmem:[#allocation6 + $0x140] ss:$16 sps:$4 sm:$0xff]   ;;  %v6246_v52 = vld [vmem:[#allocation6 + $0x148] ss:$16 sps:$4 sm:$0xff]  }
 0x221   :  { %2530 = vmatprep.subr.bf16.mxu0 %v6161_v53  ;;  %2616 = vmatprep.subr.bf16.mxu1 %v6164_v54  ;;  %v6251_v53 = vld [vmem:[#allocation6 + $0x164] ss:$16 sps:$4 sm:$0xff]   ;;  %v6254_v54 = vld [vmem:[#allocation6 + $0x16c] ss:$16 sps:$4 sm:$0xff]  }
 0x224   :  { %2531 = vmatpush1.bf16.msra.mxu0 %v6159_v55  ;;  %2617 = vmatpush1.bf16.msra.mxu1 %v6162_v56  ;;  %v6249_v55 = vld [vmem:[#allocation6 + $0x160] ss:$16 sps:$4 sm:$0xff]   ;;  %v6252_v56 = vld [vmem:[#allocation6 + $0x168] ss:$16 sps:$4 sm:$0xff]  }
 0x225   :  { %2532 = vmatprep.subr.bf16.mxu0 %v6167_v57  ;;  %2618 = vmatprep.subr.bf16.mxu1 %v6170_v58  ;;  %v6257_v57 = vld [vmem:[#allocation6 + $0x184] ss:$16 sps:$4 sm:$0xff]   ;;  %v6260_v58 = vld [vmem:[#allocation6 + $0x18c] ss:$16 sps:$4 sm:$0xff]  }
 0x228   :  { %2533 = vmatpush1.bf16.msra.mxu0 %v6165_v59  ;;  %2619 = vmatpush1.bf16.msra.mxu1 %v6168_v60  ;;  %v6255_v59 = vld [vmem:[#allocation6 + $0x180] ss:$16 sps:$4 sm:$0xff]   ;;  %v6258_v60 = vld [vmem:[#allocation6 + $0x188] ss:$16 sps:$4 sm:$0xff]  }
 0x229   :  { %2534 = vmatprep.subr.bf16.mxu0 %v6173_v61  ;;  %2620 = vmatprep.subr.bf16.mxu1 %v6176_v62  ;;  %v6263_v61 = vld [vmem:[#allocation6 + $0x1a4] ss:$16 sps:$4 sm:$0xff]   ;;  %v6266_v62 = vld [vmem:[#allocation6 + $0x1ac] ss:$16 sps:$4 sm:$0xff]  }
 0x22c   :  { %2535 = vmatpush1.bf16.msra.mxu0 %v6171_v63  ;;  %2621 = vmatpush1.bf16.msra.mxu1 %v6174_v1  ;;  %v6261_v63 = vld [vmem:[#allocation6 + $0x1a0] ss:$16 sps:$4 sm:$0xff]   ;;  %v6264_v1 = vld [vmem:[#allocation6 + $0x1a8] ss:$16 sps:$4 sm:$0xff]  }
 0x22d   :  { %2536 = vmatprep.subr.bf16.mxu0 %v6179_v2  ;;  %2622 = vmatprep.subr.bf16.mxu1 %v6182_v3  ;;  %v6269_v2 = vld [vmem:[#allocation6 + $0x1c4] ss:$16 sps:$4 sm:$0xff]   ;;  %v6272_v3 = vld [vmem:[#allocation6 + $0x1cc] ss:$16 sps:$4 sm:$0xff]  }
 0x230   :  { %2537 = vmatpush1.bf16.msra.mxu0 %v6177_v4  ;;  %2623 = vmatpush1.bf16.msra.mxu1 %v6180_v5  ;;  %v6267_v4 = vld [vmem:[#allocation6 + $0x1c0] ss:$16 sps:$4 sm:$0xff]   ;;  %v6270_v5 = vld [vmem:[#allocation6 + $0x1c8] ss:$16 sps:$4 sm:$0xff]  }
 0x231   :  { %3437 = vmatprep.subr.bf16.mxu0 %v6185_v6  ;;  %3523 = vmatprep.subr.bf16.mxu1 %v6188_v7  ;;  %v6275_v6 = vld [vmem:[#allocation6 + $0x1e4] ss:$16 sps:$4 sm:$0xff]   ;;  %v6278_v7 = vld [vmem:[#allocation6 + $0x1ec] ss:$16 sps:$4 sm:$0xff]  }
 0x233   :  { %2539 = vmatmul.mubr.bf16.vlgmr.msra.gmra.mrb[4].mxu0 %v6891_v0  ;;  %2625 = vmatmul.mubr.bf16.vlgmr.msra.gmra.mrb[4].mxu1 %v6891_v0  ;;  %v6204_v0 = vld [vmem:[#allocation6 + $0x68] ss:$16 sps:$4 sm:$0xff]  }
 0x234   :  { %3438 = vmatpush1.bf16.msra.mxu0 %v6183_v8  ;;  %3524 = vmatpush1.bf16.msra.mxu1 %v6186_v9  ;;  %v6273_v8 = vld [vmem:[#allocation6 + $0x1e0] ss:$16 sps:$4 sm:$0xff]   ;;  %v6276_v9 = vld [vmem:[#allocation6 + $0x1e8] ss:$16 sps:$4 sm:$0xff]  }
 0x235   :  { %3439 = vmatprep.subr.bf16.mxu0 %v6191_v10  ;;  %3525 = vmatprep.subr.bf16.mxu1 %v6194_v11  ;;  %v6281_v10 = vld [vmem:[#allocation6 + $0x204] ss:$16 sps:$4 sm:$0xff]   ;;  %v6284_v11 = vld [vmem:[#allocation6 + $0x20c] ss:$16 sps:$4 sm:$0xff]  }
 0x238   :  { %3440 = vmatpush1.bf16.msra.mxu0 %v6189_v12  ;;  %3526 = vmatpush1.bf16.msra.mxu1 %v6192_v13  ;;  %v1801_v12 = vld [vmem:[%s7033_s4] sm:$0xf] }
 0x239   :  { %3441 = vmatprep.subr.bf16.mxu0 %v6197_v14  ;;  %3527 = vmatprep.subr.bf16.mxu1 %v6200_v15  ;;  %v1806_v13 = vrot.slane %v1801_v12, %v6876_v30  ;;  %v1814_v14 = vrot.slane %v1801_v12, %v6878_v31  ;;  %v1810_v15 = vrot.slane %v1801_v12, %v6883_v33 }
 0x23c   :  { %3442 = vmatpush1.bf16.msra.mxu0 %v6195_v16  ;;  %3528 = vmatpush1.bf16.msra.mxu1 %v6198_v17  ;;  %v1818_v16 = vrot.slane %v1801_v12, %v6885_v34  ;;  %v6326_v12 = vld [vmem:[#allocation6 + $0x2ec] ss:$16 sps:$4 sm:$0xff]  }
 0x23d   :  { %3443 = vmatprep.subr.bf16.mxu0 %v6203_v18  ;;  %3529 = vmatprep.subr.bf16.mxu1 %v6206_v19 }
 0x240   :  { %3444 = vmatpush1.bf16.msra.mxu0 %v6201_v20  ;;  %3530 = vmatpush1.bf16.msra.mxu1 %v6204_v0 }
 0x241   :  { %3445 = vmatprep.subr.bf16.mxu0 %v6209_v21  ;;  %3531 = vmatprep.subr.bf16.mxu1 %v6212_v22 }
 0x244   :  { %3446 = vmatpush1.bf16.msra.mxu0 %v6207_v23  ;;  %3532 = vmatpush1.bf16.msra.mxu1 %v6210_v24 }
 0x245   :  { %3447 = vmatprep.subr.bf16.mxu0 %v6215_v25  ;;  %3533 = vmatprep.subr.bf16.mxu1 %v6218_v26 }
 0x248   :  { %3448 = vmatpush1.bf16.msra.mxu0 %v6213_v27  ;;  %3534 = vmatpush1.bf16.msra.mxu1 %v6216_v28 }
 0x249   :  { %3449 = vmatprep.subr.bf16.mxu0 %v6221_v29  ;;  %3535 = vmatprep.subr.bf16.mxu1 %v6224_v32 }
 0x24c   :  { %3450 = vmatpush1.bf16.msra.mxu0 %v6219_v35  ;;  %3536 = vmatpush1.bf16.msra.mxu1 %v6222_v36 }
 0x24d   :  { %3451 = vmatprep.subr.bf16.mxu0 %v6227_v37  ;;  %3537 = vmatprep.subr.bf16.mxu1 %v6230_v38 }
 0x250   :  { %3452 = vmatpush1.bf16.msra.mxu0 %v6225_v39  ;;  %3538 = vmatpush1.bf16.msra.mxu1 %v6228_v40 }
 0x251   :  { %3453 = vmatprep.subr.bf16.mxu0 %v6233_v41  ;;  %3539 = vmatprep.subr.bf16.mxu1 %v6236_v42 }
 0x254   :  { %3454 = vmatpush1.bf16.msra.mxu0 %v6231_v43  ;;  %3540 = vmatpush1.bf16.msra.mxu1 %v6234_v44 }
 0x255   :  { %3455 = vmatprep.subr.bf16.mxu0 %v6239_v45  ;;  %3541 = vmatprep.subr.bf16.mxu1 %v6242_v46 }
 0x258   :  { %3456 = vmatpush1.bf16.msra.mxu0 %v6237_v47  ;;  %3542 = vmatpush1.bf16.msra.mxu1 %v6240_v48  ;;  %v6279_v48 = vld [vmem:[#allocation6 + $0x200] ss:$16 sps:$4 sm:$0xff]  }
 0x259   :  { %3457 = vmatprep.subr.bf16.mxu0 %v6245_v49  ;;  %3543 = vmatprep.subr.bf16.mxu1 %v6248_v50  ;;  %v6282_v49 = vld [vmem:[#allocation6 + $0x208] ss:$16 sps:$4 sm:$0xff]   ;;  %v6287_v50 = vld [vmem:[#allocation6 + $0x224] ss:$16 sps:$4 sm:$0xff]  }
 0x25c   :  { %3458 = vmatpush1.bf16.msra.mxu0 %v6243_v51  ;;  %3544 = vmatpush1.bf16.msra.mxu1 %v6246_v52  ;;  %v6290_v51 = vld [vmem:[#allocation6 + $0x22c] ss:$16 sps:$4 sm:$0xff]   ;;  %v6285_v52 = vld [vmem:[#allocation6 + $0x220] ss:$16 sps:$4 sm:$0xff]  }
 0x25d   :  { %3459 = vmatprep.subr.bf16.mxu0 %v6251_v53  ;;  %3545 = vmatprep.subr.bf16.mxu1 %v6254_v54  ;;  %v6288_v53 = vld [vmem:[#allocation6 + $0x228] ss:$16 sps:$4 sm:$0xff]   ;;  %v6293_v54 = vld [vmem:[#allocation6 + $0x244] ss:$16 sps:$4 sm:$0xff]  }
 0x260   :  { %3460 = vmatpush1.bf16.msra.mxu0 %v6249_v55  ;;  %3546 = vmatpush1.bf16.msra.mxu1 %v6252_v56  ;;  %v6296_v55 = vld [vmem:[#allocation6 + $0x24c] ss:$16 sps:$4 sm:$0xff]   ;;  %v6291_v56 = vld [vmem:[#allocation6 + $0x240] ss:$16 sps:$4 sm:$0xff]  }
 0x261   :  { %3461 = vmatprep.subr.bf16.mxu0 %v6257_v57  ;;  %3547 = vmatprep.subr.bf16.mxu1 %v6260_v58  ;;  %v6294_v57 = vld [vmem:[#allocation6 + $0x248] ss:$16 sps:$4 sm:$0xff]   ;;  %v6299_v58 = vld [vmem:[#allocation6 + $0x264] ss:$16 sps:$4 sm:$0xff]  }
 0x264   :  { %3462 = vmatpush1.bf16.msra.mxu0 %v6255_v59  ;;  %3548 = vmatpush1.bf16.msra.mxu1 %v6258_v60  ;;  %v6302_v59 = vld [vmem:[#allocation6 + $0x26c] ss:$16 sps:$4 sm:$0xff]   ;;  %v6297_v60 = vld [vmem:[#allocation6 + $0x260] ss:$16 sps:$4 sm:$0xff]  }
 0x265   :  { %3463 = vmatprep.subr.bf16.mxu0 %v6263_v61  ;;  %3549 = vmatprep.subr.bf16.mxu1 %v6266_v62  ;;  %v6300_v61 = vld [vmem:[#allocation6 + $0x268] ss:$16 sps:$4 sm:$0xff]   ;;  %v6305_v62 = vld [vmem:[#allocation6 + $0x284] ss:$16 sps:$4 sm:$0xff]  }
 0x268   :  { %3464 = vmatpush1.bf16.msra.mxu0 %v6261_v63  ;;  %3550 = vmatpush1.bf16.msra.mxu1 %v6264_v1  ;;  %v6308_v63 = vld [vmem:[#allocation6 + $0x28c] ss:$16 sps:$4 sm:$0xff]   ;;  %v6303_v1 = vld [vmem:[#allocation6 + $0x280] ss:$16 sps:$4 sm:$0xff]  }
 0x269   :  { %3465 = vmatprep.subr.bf16.mxu0 %v6269_v2  ;;  %3551 = vmatprep.subr.bf16.mxu1 %v6272_v3  ;;  %v6306_v2 = vld [vmem:[#allocation6 + $0x288] ss:$16 sps:$4 sm:$0xff]   ;;  %v6311_v3 = vld [vmem:[#allocation6 + $0x2a4] ss:$16 sps:$4 sm:$0xff]  }
 0x26c   :  { %3466 = vmatpush1.bf16.msra.mxu0 %v6267_v4  ;;  %3552 = vmatpush1.bf16.msra.mxu1 %v6270_v5  ;;  %v6314_v4 = vld [vmem:[#allocation6 + $0x2ac] ss:$16 sps:$4 sm:$0xff]   ;;  %v6309_v5 = vld [vmem:[#allocation6 + $0x2a0] ss:$16 sps:$4 sm:$0xff]  }
 0x26d   :  { %3467 = vmatprep.subr.bf16.mxu0 %v6275_v6  ;;  %3553 = vmatprep.subr.bf16.mxu1 %v6278_v7  ;;  %v6312_v6 = vld [vmem:[#allocation6 + $0x2a8] ss:$16 sps:$4 sm:$0xff]   ;;  %v6317_v7 = vld [vmem:[#allocation6 + $0x2c4] ss:$16 sps:$4 sm:$0xff]  }
 0x270   :  { %3468 = vmatpush1.bf16.msra.mxu0 %v6273_v8  ;;  %3554 = vmatpush1.bf16.msra.mxu1 %v6276_v9  ;;  %v6320_v8 = vld [vmem:[#allocation6 + $0x2cc] ss:$16 sps:$4 sm:$0xff]   ;;  %v6315_v9 = vld [vmem:[#allocation6 + $0x2c0] ss:$16 sps:$4 sm:$0xff]  }
 0x271   :  { %3480 = vmatprep.subr.bf16.mxu0 %v6281_v10  ;;  %3566 = vmatprep.subr.bf16.mxu1 %v6284_v11  ;;  %v6318_v10 = vld [vmem:[#allocation6 + $0x2c8] ss:$16 sps:$4 sm:$0xff]   ;;  %v6323_v11 = vld [vmem:[#allocation6 + $0x2e4] ss:$16 sps:$4 sm:$0xff]  }
 0x306   :  { %v2540_v17 = vpop.f32.mrb[4].mxu0  ;;  %v2626_v18 = vpop.f32.mrb[4].mxu1 }
 0x307   :  { %v5618_v19 = vadd.f32 %v2540_v17, %v1806_v13  ;;  %v5622_v20 = vadd.f32 %v2626_v18, %v1814_v14  ;;  %v2542_v0 = vpop.f32.mrb[5].mxu0  ;;  %v2628_v21 = vpop.f32.mrb[5].mxu1  ;;  %v6327_v17 = vld [vmem:[#allocation6 + $0x300] ss:$16 sps:$4 sm:$0xff]   ;;  %v6330_v18 = vld [vmem:[#allocation6 + $0x308] ss:$16 sps:$4 sm:$0xff]  }
 0x308   :  { %v5619_v22 = vadd.f32 %v2542_v0, %v1810_v15  ;;  %v5623_v23 = vadd.f32 %v2628_v21, %v1818_v16  ;;  %v2544_v24 = vpop.f32.mrb[6].mxu0  ;;  %v2630_v25 = vpop.f32.mrb[6].mxu1  ;;  %v6333_v0 = vld [vmem:[#allocation6 + $0x320] ss:$16 sps:$4 sm:$0xff]   ;;  %v6336_v21 = vld [vmem:[#allocation6 + $0x328] ss:$16 sps:$4 sm:$0xff]  }
 0x309   :  { %v5620_v26 = vadd.f32 %v2544_v24, %v1806_v13  ;;  %v5624_v27 = vadd.f32 %v2630_v25, %v1814_v14  ;;  %v2546_v28 = vpop.f32.mrb[7].mxu0  ;;  %v2632_v29 = vpop.f32.mrb[7].mxu1  ;;  %v2635_v36 = vmax.f32 %v5618_v19, 0.0  ;;  %v2637_v37 = vmax.f32 %v5622_v20, 0.0  ;;  %v6321_v13 = vld [vmem:[#allocation6 + $0x2e0] ss:$16 sps:$4 sm:$0xff]  }
 0x30a   :  { %v5621_v32 = vadd.f32 %v2546_v28, %v1810_v15  ;;  %v5625_v35 = vadd.f32 %v2632_v29, %v1818_v16  ;;  %v2636_v40 = vmax.f32 %v5619_v22, 0.0  ;;  %v2638_v41 = vmax.f32 %v5623_v23, 0.0  ;;  %v6324_v14 = vld [vmem:[#allocation6 + $0x2e8] ss:$16 sps:$4 sm:$0xff]   ;;  %v6329_v15 = vld [vmem:[#allocation6 + $0x304] ss:$16 sps:$4 sm:$0xff]  }
 0x30b   :  { %v2639_v38 = vmax.f32 %v5620_v26, 0.0  ;;  %v2641_v39 = vmax.f32 %v5624_v27, 0.0  ;;  %v6332_v16 = vld [vmem:[#allocation6 + $0x30c] ss:$16 sps:$4 sm:$0xff]   ;;  %v6335_v19 = vld [vmem:[#allocation6 + $0x324] ss:$16 sps:$4 sm:$0xff]  }
 0x30c   :  { %v2640_v42 = vmax.f32 %v5621_v32, 0.0  ;;  %v2642_v43 = vmax.f32 %v5625_v35, 0.0  ;;  %v6338_v20 = vld [vmem:[#allocation6 + $0x32c] ss:$16 sps:$4 sm:$0xff]   ;;  %v6341_v22 = vld [vmem:[#allocation6 + $0x344] ss:$16 sps:$4 sm:$0xff]  }
 0x30d   :  { %v2643_v44 = vpack.c.bf16 %v2639_v38, %v2635_v36  ;;  %v6902_v45 = vpack.c.bf16 %v2641_v39, %v2637_v37  ;;  %v6344_v23 = vld [vmem:[#allocation6 + $0x34c] ss:$16 sps:$4 sm:$0xff]   ;;  %v6339_v24 = vld [vmem:[#allocation6 + $0x340] ss:$16 sps:$4 sm:$0xff]   ;;  %v6342_v25 = vld [vmem:[#allocation6 + $0x348] ss:$16 sps:$4 sm:$0xff]  }
 0x30e   :  { %v2644_v46 = vpack.c.bf16 %v2640_v42, %v2636_v40  ;;  %v2646_v47 = vpack.c.bf16 %v2642_v43, %v2638_v41  ;;  %v6347_v26 = vld [vmem:[#allocation6 + $0x364] ss:$16 sps:$4 sm:$0xff]   ;;  %v6350_v27 = vld [vmem:[#allocation6 + $0x36c] ss:$16 sps:$4 sm:$0xff]   ;;  %v6345_v28 = vld [vmem:[#allocation6 + $0x360] ss:$16 sps:$4 sm:$0xff]  }
 0x30f   :  { %v6348_v29 = vld [vmem:[#allocation6 + $0x368] ss:$16 sps:$4 sm:$0xff]   ;;  %v6353_v32 = vld [vmem:[#allocation6 + $0x384] ss:$16 sps:$4 sm:$0xff]   ;;  %v6356_v35 = vld [vmem:[#allocation6 + $0x38c] ss:$16 sps:$4 sm:$0xff]  }
 0x310   :  { %3469 = vmatprep.mubr.bf16.mxu0 %v2644_v46  ;;  %3555 = vmatprep.mubr.bf16.mxu1 %v2644_v46  ;;  %v6351_v36 = vld [vmem:[#allocation6 + $0x380] ss:$16 sps:$4 sm:$0xff]   ;;  %v6354_v37 = vld [vmem:[#allocation6 + $0x388] ss:$16 sps:$4 sm:$0xff]   ;;  %v6359_v38 = vld [vmem:[#allocation6 + $0x3a4] ss:$16 sps:$4 sm:$0xff]  }
 0x311   :  { %3470 = vmatmul.mubr.bf16.vlgmr.msra.gmra.mrb[8].mxu0 %v2643_v44  ;;  %3556 = vmatmul.mubr.bf16.vlgmr.msra.gmra.mrb[8].mxu1 %v2643_v44  ;;  %v6362_v39 = vld [vmem:[#allocation6 + $0x3ac] ss:$16 sps:$4 sm:$0xff]   ;;  %v6357_v40 = vld [vmem:[#allocation6 + $0x3a0] ss:$16 sps:$4 sm:$0xff]   ;;  %v6360_v41 = vld [vmem:[#allocation6 + $0x3a8] ss:$16 sps:$4 sm:$0xff]  }
 0x312   :  { %3481 = vmatpush1.bf16.msra.mxu0 %v6279_v48  ;;  %3567 = vmatpush1.bf16.msra.mxu1 %v6282_v49  ;;  %v6365_v42 = vld [vmem:[#allocation6 + $0x3c4] ss:$16 sps:$4 sm:$0xff]   ;;  %v6368_v43 = vld [vmem:[#allocation6 + $0x3cc] ss:$16 sps:$4 sm:$0xff]   ;;  %v6363_v44 = vld [vmem:[#allocation6 + $0x3c0] ss:$16 sps:$4 sm:$0xff]  }
 0x313   :  { %3512 = vmatprep.mubr.bf16.mxu0 %v2646_v47  ;;  %3598 = vmatprep.mubr.bf16.mxu1 %v2646_v47  ;;  %v6366_v46 = vld [vmem:[#allocation6 + $0x3c8] ss:$16 sps:$4 sm:$0xff]   ;;  %v6371_v47 = vld [vmem:[#allocation6 + $0x3e4] ss:$16 sps:$4 sm:$0xff]   ;;  %v6374_v48 = vld [vmem:[#allocation6 + $0x3ec] ss:$16 sps:$4 sm:$0xff]  }
 0x314   :  { %3482 = vmatprep.subr.bf16.mxu0 %v6287_v50  ;;  %3568 = vmatprep.subr.bf16.mxu1 %v6290_v51  ;;  %v6369_v49 = vld [vmem:[#allocation6 + $0x3e0] ss:$16 sps:$4 sm:$0xff]   ;;  %v6372_v50 = vld [vmem:[#allocation6 + $0x3e8] ss:$16 sps:$4 sm:$0xff]   ;;  %v6377_v51 = vld [vmem:[#allocation7 + $0x4] ss:$16 sps:$4 sm:$0xff]  }
 0x316   :  { %3483 = vmatpush1.bf16.msra.mxu0 %v6285_v52  ;;  %3569 = vmatpush1.bf16.msra.mxu1 %v6288_v53  ;;  %v6380_v52 = vld [vmem:[#allocation7 + $0xc] ss:$16 sps:$4 sm:$0xff]   ;;  %v6375_v53 = vld [vmem:[#allocation7] ss:$16 sps:$4 sm:$0xff]  }
 0x317   :  { %3484 = vmatprep.subr.bf16.mxu0 %v6293_v54  ;;  %3570 = vmatprep.subr.bf16.mxu1 %v6296_v55  ;;  %v6378_v54 = vld [vmem:[#allocation7 + $0x8] ss:$16 sps:$4 sm:$0xff]   ;;  %v6383_v55 = vld [vmem:[#allocation7 + $0x24] ss:$16 sps:$4 sm:$0xff]  }
 0x31a   :  { %3485 = vmatpush1.bf16.msra.mxu0 %v6291_v56  ;;  %3571 = vmatpush1.bf16.msra.mxu1 %v6294_v57  ;;  %v6386_v56 = vld [vmem:[#allocation7 + $0x2c] ss:$16 sps:$4 sm:$0xff]   ;;  %v6381_v57 = vld [vmem:[#allocation7 + $0x20] ss:$16 sps:$4 sm:$0xff]  }
 0x31b   :  { %3486 = vmatprep.subr.bf16.mxu0 %v6299_v58  ;;  %3572 = vmatprep.subr.bf16.mxu1 %v6302_v59  ;;  %v6384_v58 = vld [vmem:[#allocation7 + $0x28] ss:$16 sps:$4 sm:$0xff]   ;;  %v6389_v59 = vld [vmem:[#allocation7 + $0x44] ss:$16 sps:$4 sm:$0xff]  }
 0x31e   :  { %3487 = vmatpush1.bf16.msra.mxu0 %v6297_v60  ;;  %3573 = vmatpush1.bf16.msra.mxu1 %v6300_v61  ;;  %v6392_v60 = vld [vmem:[#allocation7 + $0x4c] ss:$16 sps:$4 sm:$0xff]   ;;  %v6387_v61 = vld [vmem:[#allocation7 + $0x40] ss:$16 sps:$4 sm:$0xff]  }
 0x31f   :  { %3488 = vmatprep.subr.bf16.mxu0 %v6305_v62  ;;  %3574 = vmatprep.subr.bf16.mxu1 %v6308_v63  ;;  %v6390_v62 = vld [vmem:[#allocation7 + $0x48] ss:$16 sps:$4 sm:$0xff]   ;;  %v6395_v63 = vld [vmem:[#allocation7 + $0x64] ss:$16 sps:$4 sm:$0xff]  }
 0x322   :  { %3489 = vmatpush1.bf16.msra.mxu0 %v6303_v1  ;;  %3575 = vmatpush1.bf16.msra.mxu1 %v6306_v2  ;;  %v6398_v1 = vld [vmem:[#allocation7 + $0x6c] ss:$16 sps:$4 sm:$0xff]   ;;  %v6393_v2 = vld [vmem:[#allocation7 + $0x60] ss:$16 sps:$4 sm:$0xff]  }
 0x323   :  { %3490 = vmatprep.subr.bf16.mxu0 %v6311_v3  ;;  %3576 = vmatprep.subr.bf16.mxu1 %v6314_v4  ;;  %v6401_v3 = vld [vmem:[#allocation7 + $0x84] ss:$16 sps:$4 sm:$0xff]   ;;  %v6404_v4 = vld [vmem:[#allocation7 + $0x8c] ss:$16 sps:$4 sm:$0xff]  }
 0x326   :  { %3491 = vmatpush1.bf16.msra.mxu0 %v6309_v5  ;;  %3577 = vmatpush1.bf16.msra.mxu1 %v6312_v6  ;;  %v6399_v5 = vld [vmem:[#allocation7 + $0x80] ss:$16 sps:$4 sm:$0xff]   ;;  %v6402_v6 = vld [vmem:[#allocation7 + $0x88] ss:$16 sps:$4 sm:$0xff]  }
 0x327   :  { %3492 = vmatprep.subr.bf16.mxu0 %v6317_v7  ;;  %3578 = vmatprep.subr.bf16.mxu1 %v6320_v8  ;;  %v6407_v7 = vld [vmem:[#allocation7 + $0xa4] ss:$16 sps:$4 sm:$0xff]   ;;  %v6410_v8 = vld [vmem:[#allocation7 + $0xac] ss:$16 sps:$4 sm:$0xff]  }
 0x32a   :  { %3493 = vmatpush1.bf16.msra.mxu0 %v6315_v9  ;;  %3579 = vmatpush1.bf16.msra.mxu1 %v6318_v10  ;;  %v6405_v9 = vld [vmem:[#allocation7 + $0xa0] ss:$16 sps:$4 sm:$0xff]   ;;  %v6408_v10 = vld [vmem:[#allocation7 + $0xa8] ss:$16 sps:$4 sm:$0xff]  }
 0x32b   :  { %3494 = vmatprep.subr.bf16.mxu0 %v6323_v11  ;;  %3580 = vmatprep.subr.bf16.mxu1 %v6326_v12  ;;  %v6413_v11 = vld [vmem:[#allocation7 + $0xc4] ss:$16 sps:$4 sm:$0xff]   ;;  %v6416_v12 = vld [vmem:[#allocation7 + $0xcc] ss:$16 sps:$4 sm:$0xff]  }
 0x32e   :  { %3495 = vmatpush1.bf16.msra.mxu0 %v6321_v13  ;;  %3581 = vmatpush1.bf16.msra.mxu1 %v6324_v14  ;;  %v6411_v13 = vld [vmem:[#allocation7 + $0xc0] ss:$16 sps:$4 sm:$0xff]   ;;  %v6414_v14 = vld [vmem:[#allocation7 + $0xc8] ss:$16 sps:$4 sm:$0xff]  }
 0x32f   :  { %3496 = vmatprep.subr.bf16.mxu0 %v6329_v15  ;;  %3582 = vmatprep.subr.bf16.mxu1 %v6332_v16  ;;  %v6419_v15 = vld [vmem:[#allocation7 + $0xe4] ss:$16 sps:$4 sm:$0xff]   ;;  %v6422_v16 = vld [vmem:[#allocation7 + $0xec] ss:$16 sps:$4 sm:$0xff]  }
 0x332   :  { %3497 = vmatpush1.bf16.msra.mxu0 %v6327_v17  ;;  %3583 = vmatpush1.bf16.msra.mxu1 %v6330_v18  ;;  %v6417_v17 = vld [vmem:[#allocation7 + $0xe0] ss:$16 sps:$4 sm:$0xff]   ;;  %v6420_v18 = vld [vmem:[#allocation7 + $0xe8] ss:$16 sps:$4 sm:$0xff]  }
 0x333   :  { %3498 = vmatprep.subr.bf16.mxu0 %v6335_v19  ;;  %3584 = vmatprep.subr.bf16.mxu1 %v6338_v20  ;;  %v6425_v19 = vld [vmem:[#allocation7 + $0x104] ss:$16 sps:$4 sm:$0xff]   ;;  %v6428_v20 = vld [vmem:[#allocation7 + $0x10c] ss:$16 sps:$4 sm:$0xff]  }
 0x336   :  { %3499 = vmatpush1.bf16.msra.mxu0 %v6333_v0  ;;  %3585 = vmatpush1.bf16.msra.mxu1 %v6336_v21  ;;  %v6423_v0 = vld [vmem:[#allocation7 + $0x100] ss:$16 sps:$4 sm:$0xff]   ;;  %v6426_v21 = vld [vmem:[#allocation7 + $0x108] ss:$16 sps:$4 sm:$0xff]  }
 0x337   :  { %3500 = vmatprep.subr.bf16.mxu0 %v6341_v22  ;;  %3586 = vmatprep.subr.bf16.mxu1 %v6344_v23  ;;  %v6431_v22 = vld [vmem:[#allocation7 + $0x124] ss:$16 sps:$4 sm:$0xff]   ;;  %v6434_v23 = vld [vmem:[#allocation7 + $0x12c] ss:$16 sps:$4 sm:$0xff]  }
 0x33a   :  { %3501 = vmatpush1.bf16.msra.mxu0 %v6339_v24  ;;  %3587 = vmatpush1.bf16.msra.mxu1 %v6342_v25  ;;  %v6429_v24 = vld [vmem:[#allocation7 + $0x120] ss:$16 sps:$4 sm:$0xff]   ;;  %v6432_v25 = vld [vmem:[#allocation7 + $0x128] ss:$16 sps:$4 sm:$0xff]  }
 0x33b   :  { %3502 = vmatprep.subr.bf16.mxu0 %v6347_v26  ;;  %3588 = vmatprep.subr.bf16.mxu1 %v6350_v27  ;;  %v6437_v26 = vld [vmem:[#allocation7 + $0x144] ss:$16 sps:$4 sm:$0xff]   ;;  %v6440_v27 = vld [vmem:[#allocation7 + $0x14c] ss:$16 sps:$4 sm:$0xff]  }
 0x33e   :  { %3503 = vmatpush1.bf16.msra.mxu0 %v6345_v28  ;;  %3589 = vmatpush1.bf16.msra.mxu1 %v6348_v29  ;;  %v6435_v28 = vld [vmem:[#allocation7 + $0x140] ss:$16 sps:$4 sm:$0xff]   ;;  %v6438_v29 = vld [vmem:[#allocation7 + $0x148] ss:$16 sps:$4 sm:$0xff]  }
 0x33f   :  { %3504 = vmatprep.subr.bf16.mxu0 %v6353_v32  ;;  %3590 = vmatprep.subr.bf16.mxu1 %v6356_v35  ;;  %v6443_v32 = vld [vmem:[#allocation7 + $0x164] ss:$16 sps:$4 sm:$0xff]   ;;  %v6446_v35 = vld [vmem:[#allocation7 + $0x16c] ss:$16 sps:$4 sm:$0xff]  }
 0x342   :  { %3505 = vmatpush1.bf16.msra.mxu0 %v6351_v36  ;;  %3591 = vmatpush1.bf16.msra.mxu1 %v6354_v37  ;;  %v6441_v36 = vld [vmem:[#allocation7 + $0x160] ss:$16 sps:$4 sm:$0xff]   ;;  %v6444_v37 = vld [vmem:[#allocation7 + $0x168] ss:$16 sps:$4 sm:$0xff]  }
 0x343   :  { %3506 = vmatprep.subr.bf16.mxu0 %v6359_v38  ;;  %3592 = vmatprep.subr.bf16.mxu1 %v6362_v39  ;;  %v6449_v38 = vld [vmem:[#allocation7 + $0x184] ss:$16 sps:$4 sm:$0xff]   ;;  %v6452_v39 = vld [vmem:[#allocation7 + $0x18c] ss:$16 sps:$4 sm:$0xff]  }
 0x346   :  { %3507 = vmatpush1.bf16.msra.mxu0 %v6357_v40  ;;  %3593 = vmatpush1.bf16.msra.mxu1 %v6360_v41  ;;  %v6447_v40 = vld [vmem:[#allocation7 + $0x180] ss:$16 sps:$4 sm:$0xff]   ;;  %v6450_v41 = vld [vmem:[#allocation7 + $0x188] ss:$16 sps:$4 sm:$0xff]  }
 0x347   :  { %3508 = vmatprep.subr.bf16.mxu0 %v6365_v42  ;;  %3594 = vmatprep.subr.bf16.mxu1 %v6368_v43  ;;  %v6455_v42 = vld [vmem:[#allocation7 + $0x1a4] ss:$16 sps:$4 sm:$0xff]   ;;  %v6458_v43 = vld [vmem:[#allocation7 + $0x1ac] ss:$16 sps:$4 sm:$0xff]  }
 0x34a   :  { %3509 = vmatpush1.bf16.msra.mxu0 %v6363_v44  ;;  %3595 = vmatpush1.bf16.msra.mxu1 %v6366_v46  ;;  %v6453_v44 = vld [vmem:[#allocation7 + $0x1a0] ss:$16 sps:$4 sm:$0xff]   ;;  %v6456_v46 = vld [vmem:[#allocation7 + $0x1a8] ss:$16 sps:$4 sm:$0xff]  }
 0x34b   :  { %3510 = vmatprep.subr.bf16.mxu0 %v6371_v47  ;;  %3596 = vmatprep.subr.bf16.mxu1 %v6374_v48  ;;  %v6461_v47 = vld [vmem:[#allocation7 + $0x1c4] ss:$16 sps:$4 sm:$0xff]   ;;  %v6464_v48 = vld [vmem:[#allocation7 + $0x1cc] ss:$16 sps:$4 sm:$0xff]  }
 0x34e   :  { %3511 = vmatpush1.bf16.msra.mxu0 %v6369_v49  ;;  %3597 = vmatpush1.bf16.msra.mxu1 %v6372_v50  ;;  %v6459_v49 = vld [vmem:[#allocation7 + $0x1c0] ss:$16 sps:$4 sm:$0xff]   ;;  %v6462_v50 = vld [vmem:[#allocation7 + $0x1c8] ss:$16 sps:$4 sm:$0xff]  }
 0x34f   :  { %4411 = vmatprep.subr.bf16.mxu0 %v6377_v51  ;;  %4497 = vmatprep.subr.bf16.mxu1 %v6380_v52  ;;  %v6467_v51 = vld [vmem:[#allocation7 + $0x1e4] ss:$16 sps:$4 sm:$0xff]   ;;  %v6470_v52 = vld [vmem:[#allocation7 + $0x1ec] ss:$16 sps:$4 sm:$0xff]  }
 0x351   :  { %3513 = vmatmul.mubr.bf16.vlgmr.msra.gmra.mrb[8].mxu0 %v6902_v45  ;;  %3599 = vmatmul.mubr.bf16.vlgmr.msra.gmra.mrb[8].mxu1 %v6902_v45  ;;  %v6396_v45 = vld [vmem:[#allocation7 + $0x68] ss:$16 sps:$4 sm:$0xff]  }
 0x352   :  { %4412 = vmatpush1.bf16.msra.mxu0 %v6375_v53  ;;  %4498 = vmatpush1.bf16.msra.mxu1 %v6378_v54  ;;  %v6465_v53 = vld [vmem:[#allocation7 + $0x1e0] ss:$16 sps:$4 sm:$0xff]   ;;  %v6468_v54 = vld [vmem:[#allocation7 + $0x1e8] ss:$16 sps:$4 sm:$0xff]  }
 0x353   :  { %4413 = vmatprep.subr.bf16.mxu0 %v6383_v55  ;;  %4499 = vmatprep.subr.bf16.mxu1 %v6386_v56  ;;  %v6473_v55 = vld [vmem:[#allocation7 + $0x204] ss:$16 sps:$4 sm:$0xff]   ;;  %v6476_v56 = vld [vmem:[#allocation7 + $0x20c] ss:$16 sps:$4 sm:$0xff]  }
 0x356   :  { %4414 = vmatpush1.bf16.msra.mxu0 %v6381_v57  ;;  %4500 = vmatpush1.bf16.msra.mxu1 %v6384_v58  ;;  %v2775_v57 = vld [vmem:[%s7035_s6] sm:$0xf] }
 0x357   :  { %4415 = vmatprep.subr.bf16.mxu0 %v6389_v59  ;;  %4501 = vmatprep.subr.bf16.mxu1 %v6392_v60  ;;  %v2780_v58 = vrot.slane %v2775_v57, %v6876_v30  ;;  %v2788_v59 = vrot.slane %v2775_v57, %v6878_v31  ;;  %v2784_v60 = vrot.slane %v2775_v57, %v6883_v33 }
 0x35a   :  { %4416 = vmatpush1.bf16.msra.mxu0 %v6387_v61  ;;  %4502 = vmatpush1.bf16.msra.mxu1 %v6390_v62  ;;  %v2792_v61 = vrot.slane %v2775_v57, %v6885_v34  ;;  %v6518_v57 = vld [vmem:[#allocation7 + $0x2ec] ss:$16 sps:$4 sm:$0xff]  }
 0x35b   :  { %4417 = vmatprep.subr.bf16.mxu0 %v6395_v63  ;;  %4503 = vmatprep.subr.bf16.mxu1 %v6398_v1 }
 0x35e   :  { %4418 = vmatpush1.bf16.msra.mxu0 %v6393_v2  ;;  %4504 = vmatpush1.bf16.msra.mxu1 %v6396_v45 }
 0x35f   :  { %4419 = vmatprep.subr.bf16.mxu0 %v6401_v3  ;;  %4505 = vmatprep.subr.bf16.mxu1 %v6404_v4 }
 0x362   :  { %4420 = vmatpush1.bf16.msra.mxu0 %v6399_v5  ;;  %4506 = vmatpush1.bf16.msra.mxu1 %v6402_v6 }
 0x363   :  { %4421 = vmatprep.subr.bf16.mxu0 %v6407_v7  ;;  %4507 = vmatprep.subr.bf16.mxu1 %v6410_v8 }
 0x366   :  { %4422 = vmatpush1.bf16.msra.mxu0 %v6405_v9  ;;  %4508 = vmatpush1.bf16.msra.mxu1 %v6408_v10 }
 0x367   :  { %4423 = vmatprep.subr.bf16.mxu0 %v6413_v11  ;;  %4509 = vmatprep.subr.bf16.mxu1 %v6416_v12 }
 0x36a   :  { %4424 = vmatpush1.bf16.msra.mxu0 %v6411_v13  ;;  %4510 = vmatpush1.bf16.msra.mxu1 %v6414_v14 }
 0x36b   :  { %4425 = vmatprep.subr.bf16.mxu0 %v6419_v15  ;;  %4511 = vmatprep.subr.bf16.mxu1 %v6422_v16 }
 0x36e   :  { %4426 = vmatpush1.bf16.msra.mxu0 %v6417_v17  ;;  %4512 = vmatpush1.bf16.msra.mxu1 %v6420_v18 }
 0x36f   :  { %4427 = vmatprep.subr.bf16.mxu0 %v6425_v19  ;;  %4513 = vmatprep.subr.bf16.mxu1 %v6428_v20 }
 0x372   :  { %4428 = vmatpush1.bf16.msra.mxu0 %v6423_v0  ;;  %4514 = vmatpush1.bf16.msra.mxu1 %v6426_v21 }
 0x373   :  { %4429 = vmatprep.subr.bf16.mxu0 %v6431_v22  ;;  %4515 = vmatprep.subr.bf16.mxu1 %v6434_v23 }
 0x376   :  { %4430 = vmatpush1.bf16.msra.mxu0 %v6429_v24  ;;  %4516 = vmatpush1.bf16.msra.mxu1 %v6432_v25  ;;  %v6471_v25 = vld [vmem:[#allocation7 + $0x200] ss:$16 sps:$4 sm:$0xff]  }
 0x377   :  { %4431 = vmatprep.subr.bf16.mxu0 %v6437_v26  ;;  %4517 = vmatprep.subr.bf16.mxu1 %v6440_v27  ;;  %v6474_v26 = vld [vmem:[#allocation7 + $0x208] ss:$16 sps:$4 sm:$0xff]   ;;  %v6479_v27 = vld [vmem:[#allocation7 + $0x224] ss:$16 sps:$4 sm:$0xff]  }
 0x37a   :  { %4432 = vmatpush1.bf16.msra.mxu0 %v6435_v28  ;;  %4518 = vmatpush1.bf16.msra.mxu1 %v6438_v29  ;;  %v6482_v28 = vld [vmem:[#allocation7 + $0x22c] ss:$16 sps:$4 sm:$0xff]   ;;  %v6477_v29 = vld [vmem:[#allocation7 + $0x220] ss:$16 sps:$4 sm:$0xff]  }
 0x37b   :  { %4433 = vmatprep.subr.bf16.mxu0 %v6443_v32  ;;  %4519 = vmatprep.subr.bf16.mxu1 %v6446_v35  ;;  %v6480_v32 = vld [vmem:[#allocation7 + $0x228] ss:$16 sps:$4 sm:$0xff]   ;;  %v6485_v35 = vld [vmem:[#allocation7 + $0x244] ss:$16 sps:$4 sm:$0xff]  }
 0x37e   :  { %4434 = vmatpush1.bf16.msra.mxu0 %v6441_v36  ;;  %4520 = vmatpush1.bf16.msra.mxu1 %v6444_v37  ;;  %v6488_v36 = vld [vmem:[#allocation7 + $0x24c] ss:$16 sps:$4 sm:$0xff]   ;;  %v6483_v37 = vld [vmem:[#allocation7 + $0x240] ss:$16 sps:$4 sm:$0xff]  }
 0x37f   :  { %4435 = vmatprep.subr.bf16.mxu0 %v6449_v38  ;;  %4521 = vmatprep.subr.bf16.mxu1 %v6452_v39  ;;  %v6486_v38 = vld [vmem:[#allocation7 + $0x248] ss:$16 sps:$4 sm:$0xff]   ;;  %v6491_v39 = vld [vmem:[#allocation7 + $0x264] ss:$16 sps:$4 sm:$0xff]  }
 0x382   :  { %4436 = vmatpush1.bf16.msra.mxu0 %v6447_v40  ;;  %4522 = vmatpush1.bf16.msra.mxu1 %v6450_v41  ;;  %v6494_v40 = vld [vmem:[#allocation7 + $0x26c] ss:$16 sps:$4 sm:$0xff]   ;;  %v6489_v41 = vld [vmem:[#allocation7 + $0x260] ss:$16 sps:$4 sm:$0xff]  }
 0x383   :  { %4437 = vmatprep.subr.bf16.mxu0 %v6455_v42  ;;  %4523 = vmatprep.subr.bf16.mxu1 %v6458_v43  ;;  %v6492_v42 = vld [vmem:[#allocation7 + $0x268] ss:$16 sps:$4 sm:$0xff]   ;;  %v6497_v43 = vld [vmem:[#allocation7 + $0x284] ss:$16 sps:$4 sm:$0xff]  }
 0x386   :  { %4438 = vmatpush1.bf16.msra.mxu0 %v6453_v44  ;;  %4524 = vmatpush1.bf16.msra.mxu1 %v6456_v46  ;;  %v6500_v44 = vld [vmem:[#allocation7 + $0x28c] ss:$16 sps:$4 sm:$0xff]   ;;  %v6495_v46 = vld [vmem:[#allocation7 + $0x280] ss:$16 sps:$4 sm:$0xff]  }
 0x387   :  { %4439 = vmatprep.subr.bf16.mxu0 %v6461_v47  ;;  %4525 = vmatprep.subr.bf16.mxu1 %v6464_v48  ;;  %v6498_v47 = vld [vmem:[#allocation7 + $0x288] ss:$16 sps:$4 sm:$0xff]   ;;  %v6503_v48 = vld [vmem:[#allocation7 + $0x2a4] ss:$16 sps:$4 sm:$0xff]  }
 0x38a   :  { %4440 = vmatpush1.bf16.msra.mxu0 %v6459_v49  ;;  %4526 = vmatpush1.bf16.msra.mxu1 %v6462_v50  ;;  %v6506_v49 = vld [vmem:[#allocation7 + $0x2ac] ss:$16 sps:$4 sm:$0xff]   ;;  %v6501_v50 = vld [vmem:[#allocation7 + $0x2a0] ss:$16 sps:$4 sm:$0xff]  }
 0x38b   :  { %4441 = vmatprep.subr.bf16.mxu0 %v6467_v51  ;;  %4527 = vmatprep.subr.bf16.mxu1 %v6470_v52  ;;  %v6504_v51 = vld [vmem:[#allocation7 + $0x2a8] ss:$16 sps:$4 sm:$0xff]   ;;  %v6509_v52 = vld [vmem:[#allocation7 + $0x2c4] ss:$16 sps:$4 sm:$0xff]  }
 0x38e   :  { %4442 = vmatpush1.bf16.msra.mxu0 %v6465_v53  ;;  %4528 = vmatpush1.bf16.msra.mxu1 %v6468_v54  ;;  %v6512_v53 = vld [vmem:[#allocation7 + $0x2cc] ss:$16 sps:$4 sm:$0xff]   ;;  %v6507_v54 = vld [vmem:[#allocation7 + $0x2c0] ss:$16 sps:$4 sm:$0xff]  }
 0x38f   :  { %4454 = vmatprep.subr.bf16.mxu0 %v6473_v55  ;;  %4540 = vmatprep.subr.bf16.mxu1 %v6476_v56  ;;  %v6510_v55 = vld [vmem:[#allocation7 + $0x2c8] ss:$16 sps:$4 sm:$0xff]   ;;  %v6515_v56 = vld [vmem:[#allocation7 + $0x2e4] ss:$16 sps:$4 sm:$0xff]  }
 0x424   :  { %v3514_v62 = vpop.f32.mrb[8].mxu0  ;;  %v3600_v63 = vpop.f32.mrb[8].mxu1 }
 0x425   :  { %v5626_v1 = vadd.f32 %v3514_v62, %v2780_v58  ;;  %v5630_v2 = vadd.f32 %v3600_v63, %v2788_v59  ;;  %v3516_v45 = vpop.f32.mrb[9].mxu0  ;;  %v3602_v3 = vpop.f32.mrb[9].mxu1  ;;  %v6519_v62 = vld [vmem:[#allocation7 + $0x300] ss:$16 sps:$4 sm:$0xff]   ;;  %v6522_v63 = vld [vmem:[#allocation7 + $0x308] ss:$16 sps:$4 sm:$0xff]  }
 0x426   :  { %v5627_v4 = vadd.f32 %v3516_v45, %v2784_v60  ;;  %v5631_v5 = vadd.f32 %v3602_v3, %v2792_v61  ;;  %v3518_v6 = vpop.f32.mrb[10].mxu0  ;;  %v3604_v7 = vpop.f32.mrb[10].mxu1  ;;  %v6525_v45 = vld [vmem:[#allocation7 + $0x320] ss:$16 sps:$4 sm:$0xff]   ;;  %v6528_v3 = vld [vmem:[#allocation7 + $0x328] ss:$16 sps:$4 sm:$0xff]  }
 0x427   :  { %v5628_v8 = vadd.f32 %v3518_v6, %v2780_v58  ;;  %v5632_v9 = vadd.f32 %v3604_v7, %v2788_v59  ;;  %v3520_v10 = vpop.f32.mrb[11].mxu0  ;;  %v3606_v11 = vpop.f32.mrb[11].mxu1  ;;  %v3609_v14 = vmax.f32 %v5626_v1, 0.0  ;;  %v3611_v15 = vmax.f32 %v5630_v2, 0.0  ;;  %v6513_v58 = vld [vmem:[#allocation7 + $0x2e0] ss:$16 sps:$4 sm:$0xff]  }
 0x428   :  { %v5629_v12 = vadd.f32 %v3520_v10, %v2784_v60  ;;  %v5633_v13 = vadd.f32 %v3606_v11, %v2792_v61  ;;  %v3610_v18 = vmax.f32 %v5627_v4, 0.0  ;;  %v3612_v19 = vmax.f32 %v5631_v5, 0.0  ;;  %v6516_v59 = vld [vmem:[#allocation7 + $0x2e8] ss:$16 sps:$4 sm:$0xff]   ;;  %v6521_v60 = vld [vmem:[#allocation7 + $0x304] ss:$16 sps:$4 sm:$0xff]  }
 0x429   :  { %v3613_v16 = vmax.f32 %v5628_v8, 0.0  ;;  %v3615_v17 = vmax.f32 %v5632_v9, 0.0  ;;  %v6524_v61 = vld [vmem:[#allocation7 + $0x30c] ss:$16 sps:$4 sm:$0xff]   ;;  %v6527_v1 = vld [vmem:[#allocation7 + $0x324] ss:$16 sps:$4 sm:$0xff]  }
 0x42a   :  { %v3614_v20 = vmax.f32 %v5629_v12, 0.0  ;;  %v3616_v0 = vmax.f32 %v5633_v13, 0.0  ;;  %v6530_v2 = vld [vmem:[#allocation7 + $0x32c] ss:$16 sps:$4 sm:$0xff]   ;;  %v6533_v4 = vld [vmem:[#allocation7 + $0x344] ss:$16 sps:$4 sm:$0xff]  }
 0x42b   :  { %v3617_v21 = vpack.c.bf16 %v3613_v16, %v3609_v14  ;;  %v6913_v22 = vpack.c.bf16 %v3615_v17, %v3611_v15  ;;  %v6536_v5 = vld [vmem:[#allocation7 + $0x34c] ss:$16 sps:$4 sm:$0xff]   ;;  %v6531_v6 = vld [vmem:[#allocation7 + $0x340] ss:$16 sps:$4 sm:$0xff]   ;;  %v6534_v7 = vld [vmem:[#allocation7 + $0x348] ss:$16 sps:$4 sm:$0xff]  }
 0x42c   :  { %v3618_v23 = vpack.c.bf16 %v3614_v20, %v3610_v18  ;;  %v3620_v24 = vpack.c.bf16 %v3616_v0, %v3612_v19  ;;  %v6539_v8 = vld [vmem:[#allocation7 + $0x364] ss:$16 sps:$4 sm:$0xff]   ;;  %v6542_v9 = vld [vmem:[#allocation7 + $0x36c] ss:$16 sps:$4 sm:$0xff]   ;;  %v6537_v10 = vld [vmem:[#allocation7 + $0x360] ss:$16 sps:$4 sm:$0xff]  }
 0x42d   :  { %v6540_v11 = vld [vmem:[#allocation7 + $0x368] ss:$16 sps:$4 sm:$0xff]   ;;  %v6545_v12 = vld [vmem:[#allocation7 + $0x384] ss:$16 sps:$4 sm:$0xff]   ;;  %v6548_v13 = vld [vmem:[#allocation7 + $0x38c] ss:$16 sps:$4 sm:$0xff]  }
 0x42e   :  { %4443 = vmatprep.mubr.bf16.mxu0 %v3618_v23  ;;  %4529 = vmatprep.mubr.bf16.mxu1 %v3618_v23  ;;  %v6543_v14 = vld [vmem:[#allocation7 + $0x380] ss:$16 sps:$4 sm:$0xff]   ;;  %v6546_v15 = vld [vmem:[#allocation7 + $0x388] ss:$16 sps:$4 sm:$0xff]   ;;  %v6551_v16 = vld [vmem:[#allocation7 + $0x3a4] ss:$16 sps:$4 sm:$0xff]  }
 0x42f   :  { %4444 = vmatmul.mubr.bf16.vlgmr.msra.gmra.mrb[12].mxu0 %v3617_v21  ;;  %4530 = vmatmul.mubr.bf16.vlgmr.msra.gmra.mrb[12].mxu1 %v3617_v21  ;;  %v6554_v17 = vld [vmem:[#allocation7 + $0x3ac] ss:$16 sps:$4 sm:$0xff]   ;;  %v6549_v18 = vld [vmem:[#allocation7 + $0x3a0] ss:$16 sps:$4 sm:$0xff]   ;;  %v6552_v19 = vld [vmem:[#allocation7 + $0x3a8] ss:$16 sps:$4 sm:$0xff]  }
 0x430   :  { %4455 = vmatpush1.bf16.msra.mxu0 %v6471_v25  ;;  %4541 = vmatpush1.bf16.msra.mxu1 %v6474_v26  ;;  %v6557_v20 = vld [vmem:[#allocation7 + $0x3c4] ss:$16 sps:$4 sm:$0xff]   ;;  %v6560_v0 = vld [vmem:[#allocation7 + $0x3cc] ss:$16 sps:$4 sm:$0xff]   ;;  %v6555_v21 = vld [vmem:[#allocation7 + $0x3c0] ss:$16 sps:$4 sm:$0xff]  }
 0x431   :  { %4486 = vmatprep.mubr.bf16.mxu0 %v3620_v24  ;;  %4572 = vmatprep.mubr.bf16.mxu1 %v3620_v24  ;;  %v6558_v23 = vld [vmem:[#allocation7 + $0x3c8] ss:$16 sps:$4 sm:$0xff]   ;;  %v6563_v24 = vld [vmem:[#allocation7 + $0x3e4] ss:$16 sps:$4 sm:$0xff]   ;;  %v6566_v25 = vld [vmem:[#allocation7 + $0x3ec] ss:$16 sps:$4 sm:$0xff]  }
 0x432   :  { %4456 = vmatprep.subr.bf16.mxu0 %v6479_v27  ;;  %4542 = vmatprep.subr.bf16.mxu1 %v6482_v28  ;;  %v6561_v26 = vld [vmem:[#allocation7 + $0x3e0] ss:$16 sps:$4 sm:$0xff]   ;;  %v6564_v27 = vld [vmem:[#allocation7 + $0x3e8] ss:$16 sps:$4 sm:$0xff]  }
 0x433   :  { %v6567_v28 = vld [vmem:[%s7038_s9 + $0x40] sm:$0xff]  }
 0x434   :  { %4457 = vmatpush1.bf16.msra.mxu0 %v6477_v29  ;;  %4543 = vmatpush1.bf16.msra.mxu1 %v6480_v32  ;;  %v6568_v29 = vld [vmem:[%s7038_s9 + $0xc0] sm:$0xff]  }
 0x435   :  { %4458 = vmatprep.subr.bf16.mxu0 %v6485_v35  ;;  %4544 = vmatprep.subr.bf16.mxu1 %v6488_v36  ;;  %v6569_v32 = vld [vmem:[%s7038_s9] sm:$0xff]   ;;  %v6571_v36 = vld [vmem:[%s7038_s9 + $0x48] sm:$0xff]  }
 0x436   :  { %v6570_v35 = vld [vmem:[%s7038_s9 + $0x80] sm:$0xff]  }
 0x438   :  { %4459 = vmatpush1.bf16.msra.mxu0 %v6483_v37  ;;  %4545 = vmatpush1.bf16.msra.mxu1 %v6486_v38  ;;  %v6572_v37 = vld [vmem:[%s7038_s9 + $0xc8] sm:$0xff]  }
 0x439   :  { %4460 = vmatprep.subr.bf16.mxu0 %v6491_v39  ;;  %4546 = vmatprep.subr.bf16.mxu1 %v6494_v40  ;;  %v6573_v38 = vld [vmem:[%s7038_s9 + $0x8] sm:$0xff]   ;;  %v6575_v40 = vld [vmem:[%s7038_s9 + $0x50] sm:$0xff]  }
 0x43a   :  { %v6574_v39 = vld [vmem:[%s7038_s9 + $0x88] sm:$0xff]  }
 0x43c   :  { %4461 = vmatpush1.bf16.msra.mxu0 %v6489_v41  ;;  %4547 = vmatpush1.bf16.msra.mxu1 %v6492_v42  ;;  %v6577_v41 = vld [vmem:[%s7038_s9 + $0x10] sm:$0xff]  }
 0x43d   :  { %4462 = vmatprep.subr.bf16.mxu0 %v6497_v43  ;;  %4548 = vmatprep.subr.bf16.mxu1 %v6500_v44  ;;  %v6578_v42 = vld [vmem:[%s7038_s9 + $0x90] sm:$0xff]   ;;  %v6579_v43 = vld [vmem:[%s7038_s9 + $0x58] sm:$0xff]  }
 0x43e   :  { %v6580_v44 = vld [vmem:[%s7038_s9 + $0xd8] sm:$0xff]  }
 0x440   :  { %4463 = vmatpush1.bf16.msra.mxu0 %v6495_v46  ;;  %4549 = vmatpush1.bf16.msra.mxu1 %v6498_v47  ;;  %v6581_v46 = vld [vmem:[%s7038_s9 + $0x18] sm:$0xff]  }
 0x441   :  { %4464 = vmatprep.subr.bf16.mxu0 %v6503_v48  ;;  %4550 = vmatprep.subr.bf16.mxu1 %v6506_v49  ;;  %v6582_v47 = vld [vmem:[%s7038_s9 + $0x98] sm:$0xff]   ;;  %v6583_v48 = vld [vmem:[%s7038_s9 + $0x60] sm:$0xff]  }
 0x442   :  { %v6584_v49 = vld [vmem:[%s7038_s9 + $0xe0] sm:$0xff]  }
 0x444   :  { %4465 = vmatpush1.bf16.msra.mxu0 %v6501_v50  ;;  %4551 = vmatpush1.bf16.msra.mxu1 %v6504_v51  ;;  %v6585_v50 = vld [vmem:[%s7038_s9 + $0x20] sm:$0xff]  }
 0x445   :  { %4466 = vmatprep.subr.bf16.mxu0 %v6509_v52  ;;  %4552 = vmatprep.subr.bf16.mxu1 %v6512_v53  ;;  %v6586_v51 = vld [vmem:[%s7038_s9 + $0xa0] sm:$0xff]   ;;  %v6587_v52 = vld [vmem:[%s7038_s9 + $0x68] sm:$0xff]  }
 0x446   :  { %v6588_v53 = vld [vmem:[%s7038_s9 + $0xe8] sm:$0xff]  }
 0x448   :  { %4467 = vmatpush1.bf16.msra.mxu0 %v6507_v54  ;;  %4553 = vmatpush1.bf16.msra.mxu1 %v6510_v55  ;;  %v6589_v54 = vld [vmem:[%s7038_s9 + $0x28] sm:$0xff]  }
 0x449   :  { %4468 = vmatprep.subr.bf16.mxu0 %v6515_v56  ;;  %4554 = vmatprep.subr.bf16.mxu1 %v6518_v57  ;;  %v6590_v55 = vld [vmem:[%s7038_s9 + $0xa8] sm:$0xff]   ;;  %v6591_v56 = vld [vmem:[%s7038_s9 + $0x70] sm:$0xff]  }
 0x44a   :  { %v6592_v57 = vld [vmem:[%s7038_s9 + $0xf0] sm:$0xff]  }
 0x44c   :  { %4469 = vmatpush1.bf16.msra.mxu0 %v6513_v58  ;;  %4555 = vmatpush1.bf16.msra.mxu1 %v6516_v59  ;;  %v6593_v58 = vld [vmem:[%s7038_s9 + $0x30] sm:$0xff]  }
 0x44d   :  { %4470 = vmatprep.subr.bf16.mxu0 %v6521_v60  ;;  %4556 = vmatprep.subr.bf16.mxu1 %v6524_v61  ;;  %v6594_v59 = vld [vmem:[%s7038_s9 + $0xb0] sm:$0xff]   ;;  %v6595_v60 = vld [vmem:[%s7038_s9 + $0x78] sm:$0xff]  }
 0x44e   :  { %v6596_v61 = vld [vmem:[%s7038_s9 + $0xf8] sm:$0xff]  }
 0x450   :  { %4471 = vmatpush1.bf16.msra.mxu0 %v6519_v62  ;;  %4557 = vmatpush1.bf16.msra.mxu1 %v6522_v63  ;;  %v6597_v62 = vld [vmem:[%s7038_s9 + $0x38] sm:$0xff]  }
 0x451   :  { %4472 = vmatprep.subr.bf16.mxu0 %v6527_v1  ;;  %4558 = vmatprep.subr.bf16.mxu1 %v6530_v2  ;;  %v6598_v63 = vld [vmem:[%s7038_s9 + $0xb8] sm:$0xff]   ;;  %v3749_v1 = vld [vmem:[%s7037_s8] sm:$0xf] }
 0x452   :  { %v3754_v2 = vrot.slane %v3749_v1, %v6876_v30 }
 0x454   :  { %4473 = vmatpush1.bf16.msra.mxu0 %v6525_v45  ;;  %4559 = vmatpush1.bf16.msra.mxu1 %v6528_v3  ;;  %v3762_v45 = vrot.slane %v3749_v1, %v6878_v31  ;;  %v3758_v3 = vrot.slane %v3749_v1, %v6883_v33 }
 0x455   :  { %4474 = vmatprep.subr.bf16.mxu0 %v6533_v4  ;;  %4560 = vmatprep.subr.bf16.mxu1 %v6536_v5  ;;  %v3766_v4 = vrot.slane %v3749_v1, %v6885_v34 }
 0x458   :  { %4475 = vmatpush1.bf16.msra.mxu0 %v6531_v6  ;;  %4561 = vmatpush1.bf16.msra.mxu1 %v6534_v7 }
 0x459   :  { %4476 = vmatprep.subr.bf16.mxu0 %v6539_v8  ;;  %4562 = vmatprep.subr.bf16.mxu1 %v6542_v9 }
 0x45c   :  { %4477 = vmatpush1.bf16.msra.mxu0 %v6537_v10  ;;  %4563 = vmatpush1.bf16.msra.mxu1 %v6540_v11 }
 0x45d   :  { %4478 = vmatprep.subr.bf16.mxu0 %v6545_v12  ;;  %4564 = vmatprep.subr.bf16.mxu1 %v6548_v13 }
 0x460   :  { %4479 = vmatpush1.bf16.msra.mxu0 %v6543_v14  ;;  %4565 = vmatpush1.bf16.msra.mxu1 %v6546_v15 }
 0x461   :  { %4480 = vmatprep.subr.bf16.mxu0 %v6551_v16  ;;  %4566 = vmatprep.subr.bf16.mxu1 %v6554_v17 }
 0x464   :  { %4481 = vmatpush1.bf16.msra.mxu0 %v6549_v18  ;;  %4567 = vmatpush1.bf16.msra.mxu1 %v6552_v19 }
 0x465   :  { %4482 = vmatprep.subr.bf16.mxu0 %v6557_v20  ;;  %4568 = vmatprep.subr.bf16.mxu1 %v6560_v0 }
 0x468   :  { %4483 = vmatpush1.bf16.msra.mxu0 %v6555_v21  ;;  %4569 = vmatpush1.bf16.msra.mxu1 %v6558_v23 }
 0x469   :  { %4484 = vmatprep.subr.bf16.mxu0 %v6563_v24  ;;  %4570 = vmatprep.subr.bf16.mxu1 %v6566_v25 }
 0x46c   :  { %4485 = vmatpush1.bf16.msra.mxu0 %v6561_v26  ;;  %4571 = vmatpush1.bf16.msra.mxu1 %v6564_v27 }
 0x46d   :  { %5566 = vmatprep.subr.bf16.mxu0 %v6567_v28  ;;  %5588 = vmatprep.subr.bf16.mxu1 %v6568_v29 }
 0x46f   :  { %4487 = vmatmul.mubr.bf16.vlgmr.msra.gmra.mrb[12].mxu0 %v6913_v22  ;;  %4573 = vmatmul.mubr.bf16.vlgmr.msra.gmra.mrb[12].mxu1 %v6913_v22  ;;  %v6576_v22 = vld [vmem:[%s7038_s9 + $0xd0] sm:$0xff]  }
 0x470   :  { %5567 = vmatpush3.bf16.msra.mxu0 %v6569_v32  ;;  %5589 = vmatpush3.bf16.msra.mxu1 %v6570_v35  ;;  %v5533_v35 = vld [vmem:[%s7039_s10] ss:$0 sm:$0xff] }
 0x471   :  { %5568 = vmatprep.subr.bf16.mxu0 %v6571_v36  ;;  %5590 = vmatprep.subr.bf16.mxu1 %v6572_v37 }
 0x474   :  { %5569 = vmatpush3.bf16.msra.mxu0 %v6573_v38  ;;  %5591 = vmatpush3.bf16.msra.mxu1 %v6574_v39 }
 0x475   :  { %5570 = vmatprep.subr.bf16.mxu0 %v6575_v40  ;;  %5592 = vmatprep.subr.bf16.mxu1 %v6576_v22 }
 0x478   :  { %5571 = vmatpush3.bf16.msra.mxu0 %v6577_v41  ;;  %5593 = vmatpush3.bf16.msra.mxu1 %v6578_v42 }
 0x479   :  { %5572 = vmatprep.subr.bf16.mxu0 %v6579_v43  ;;  %5594 = vmatprep.subr.bf16.mxu1 %v6580_v44 }
 0x47c   :  { %5573 = vmatpush3.bf16.msra.mxu0 %v6581_v46  ;;  %5595 = vmatpush3.bf16.msra.mxu1 %v6582_v47 }
 0x47d   :  { %5574 = vmatprep.subr.bf16.mxu0 %v6583_v48  ;;  %5596 = vmatprep.subr.bf16.mxu1 %v6584_v49 }
 0x480   :  { %5575 = vmatpush3.bf16.msra.mxu0 %v6585_v50  ;;  %5597 = vmatpush3.bf16.msra.mxu1 %v6586_v51 }
 0x481   :  { %5576 = vmatprep.subr.bf16.mxu0 %v6587_v52  ;;  %5598 = vmatprep.subr.bf16.mxu1 %v6588_v53 }
 0x484   :  { %5577 = vmatpush3.bf16.msra.mxu0 %v6589_v54  ;;  %5599 = vmatpush3.bf16.msra.mxu1 %v6590_v55 }
 0x485   :  { %5578 = vmatprep.subr.bf16.mxu0 %v6591_v56  ;;  %5600 = vmatprep.subr.bf16.mxu1 %v6592_v57 }
 0x488   :  { %5579 = vmatpush3.bf16.msra.mxu0 %v6593_v58  ;;  %5601 = vmatpush3.bf16.msra.mxu1 %v6594_v59 }
 0x489   :  { %5580 = vmatprep.subr.bf16.mxu0 %v6595_v60  ;;  %5602 = vmatprep.subr.bf16.mxu1 %v6596_v61 }
 0x48c   :  { %5581 = vmatpush3.bf16.msra.mxu0 %v6597_v62  ;;  %5603 = vmatpush3.bf16.msra.mxu1 %v6598_v63 }
 0x542   :  { %v4488_v5 = vpop.f32.mrb[12].mxu0  ;;  %v4574_v6 = vpop.f32.mrb[12].mxu1 }
 0x543   :  { %v5634_v7 = vadd.f32 %v4488_v5, %v3754_v2  ;;  %v5638_v8 = vadd.f32 %v4574_v6, %v3762_v45  ;;  %v4490_v9 = vpop.f32.mrb[13].mxu0  ;;  %v4576_v10 = vpop.f32.mrb[13].mxu1 }
 0x544   :  { %v5635_v11 = vadd.f32 %v4490_v9, %v3758_v3  ;;  %v5639_v12 = vadd.f32 %v4576_v10, %v3766_v4  ;;  %v4492_v13 = vpop.f32.mrb[14].mxu0  ;;  %v4578_v14 = vpop.f32.mrb[14].mxu1 }
 0x545   :  { %v5636_v15 = vadd.f32 %v4492_v13, %v3754_v2  ;;  %v5640_v16 = vadd.f32 %v4578_v14, %v3762_v45  ;;  %v4494_v17 = vpop.f32.mrb[15].mxu0  ;;  %v4580_v30 = vpop.f32.mrb[15].mxu1  ;;  %v4583_v19 = vmax.f32 %v5634_v7, 0.0  ;;  %v4585_v33 = vmax.f32 %v5638_v8, 0.0 }
 0x546   :  { %v5637_v18 = vadd.f32 %v4494_v17, %v3758_v3  ;;  %v5641_v31 = vadd.f32 %v4580_v30, %v3766_v4  ;;  %v4584_v0 = vmax.f32 %v5635_v11, 0.0  ;;  %v4586_v21 = vmax.f32 %v5639_v12, 0.0 }
 0x547   :  { %v4587_v20 = vmax.f32 %v5636_v15, 0.0  ;;  %v4589_v34 = vmax.f32 %v5640_v16, 0.0 }
 0x548   :  { %v4588_v23 = vmax.f32 %v5637_v18, 0.0  ;;  %v4590_v24 = vmax.f32 %v5641_v31, 0.0 }
 0x549   :  { %v4591_v25 = vpack.c.bf16 %v4587_v20, %v4583_v19  ;;  %v4593_v26 = vpack.c.bf16 %v4589_v34, %v4585_v33 }
 0x54a   :  { %v4592_v27 = vpack.c.bf16 %v4588_v23, %v4584_v0  ;;  %v4594_v28 = vpack.c.bf16 %v4590_v24, %v4586_v21 }
 0x54c   :  { %4890 = vmatprep.mubr.bf16.mxu0 %v4592_v27  ;;  %4931 = vmatprep.mubr.bf16.mxu1 %v4594_v28 }
 0x54d   :  { %4891 = vmatmul.mubr.bf16.vlgmr.msra.gmra.mrb[16].mxu0 %v4591_v25  ;;  %4932 = vmatmul.mubr.bf16.vlgmr.msra.gmra.mrb[16].mxu1 %v4593_v26 }
 0x620   :  { %v5582_v29 = vpop.f32.mrb[16].mxu0  ;;  %v5604_v32 = vpop.f32.mrb[16].mxu1 }
 0x621   :  { %v5583_v36 = vpop.f32.mrb[17].mxu0  ;;  %v5605_v37 = vpop.f32.mrb[17].mxu1 }
 0x622   :  { %v5584_v38 = vadd.f32 %v5583_v36, %v5582_v29  ;;  %v5606_v39 = vadd.f32 %v5605_v37, %v5604_v32  ;;  %v5585_v40 = vpop.f32.mrb[18].mxu0  ;;  %v5607_v22 = vpop.f32.mrb[18].mxu1 }
 0x623   :  { %v5586_v41 = vpop.f32.mrb[19].mxu0  ;;  %v5608_v42 = vpop.f32.mrb[19].mxu1 }
 0x624   :  { %v4893_v43 = vadd.f32 %v5584_v38, %v5533_v35  ;;  %v5587_v44 = vadd.f32 %v5586_v41, %v5585_v40  ;;  %v5609_v46 = vadd.f32 %v5608_v42, %v5607_v22 }
 0x626   :  { %v4934_v47 = vadd.f32 %v5606_v39, %v4893_v43  ;;  %v4896_v48 = vadd.f32 %v5587_v44, %v5533_v35 }
 0x628   :  { %v4940_v49 = vmax.f32 %v4934_v47, 0.0  ;;  %v4937_v50 = vadd.f32 %v5609_v46, %v4896_v48 }
 0x62a   :  { %4942 = vst [vmem:[%s7040_s11] sm:$0xff] %v4940_v49  ;;  %v4941_v51 = vmax.f32 %v4937_v50, 0.0 }
 0x62c   :  { %4943 = vst [vmem:[%s7040_s11 + $0x8] sm:$0xff] %v4941_v51 }
 0x62d   :  { %4948 = vsyncpa [#allocation3], 1 }
 0x62e   :  { %4949 = vsyncpa [#allocation5], 1 }
 0x62f   :  { %4950 = vsyncpa [#allocation8], 1 }

</bundles_post_ra>
